<compile_context>
chip_gen: v5e
topology: v5e:2x2
jax: 0.10.0
libtpu: 0.0.40
codegen_flags: <defaults>
</compile_context>

<pallas_src>
import functools

import jax
import jax.numpy as jnp
from jax import lax
from jax.experimental import pallas as pl
from jax.experimental.pallas import tpu as pltpu


def _mha_kernel(q_in_ref, k_in_ref, v_in_ref, mask_ref,
                wq_ref, wk_ref, wv_ref, wfc_ref, gamma_ref, beta_ref,
                out_ref, attn_ref,
                k_proj_ref, v_proj_ref, q_proj_ref, ctx_ref,
                *, n_heads, d_k, d_v, head_group, eps):
    qi = pl.program_id(1)

    # ---- K/V projections: once per batch element, all heads at once (bf16 scratch).
    @pl.when(qi == 0)
    def _():
        k_proj_ref[...] = jnp.dot(
            k_in_ref[0], wk_ref[...],
            preferred_element_type=jnp.float32).astype(jnp.bfloat16)     # (S, H*dk)
        v_proj_ref[...] = jnp.dot(
            v_in_ref[0], wv_ref[...],
            preferred_element_type=jnp.float32).astype(jnp.bfloat16)     # (S, H*dv)

    x_q = q_in_ref[0]                                                    # (qb, D) f32
    masked = mask_ref[0] != 0                                            # (qb, S)

    # ---- Q projection for all heads; fold 1/sqrt(d_k) into Q once; keep in scratch.
    scale = jnp.float32(1.0 / (d_k ** 0.5))
    q_all = jnp.dot(x_q.astype(jnp.bfloat16), wq_ref[...],
                    preferred_element_type=jnp.float32) * scale          # (qb, H*dk)
    q_proj_ref[...] = q_all.astype(jnp.bfloat16)

    neg_big = jnp.float32(-1000000000.0)

    # ---- per-head attention; ctx stored in lane-dense groups of heads.
    for g0 in range(0, n_heads, head_group):
        ctx_parts = []
        for h in range(g0, g0 + head_group):
            q_h = q_proj_ref[:, h * d_k:(h + 1) * d_k]                   # (qb, dk) bf16
            k_h = k_proj_ref[:, h * d_k:(h + 1) * d_k]                   # (S,  dk) bf16
            v_h = v_proj_ref[:, h * d_v:(h + 1) * d_v]                   # (S,  dv) bf16

            # scores = q_h @ k_h^T without materializing a transpose.
            scores = lax.dot_general(
                q_h, k_h, dimension_numbers=(((1,), (1,)), ((), ())),
                preferred_element_type=jnp.float32)                      # (qb, S) f32
            scores = jnp.where(masked, neg_big, scores)

            # softmax (f32)
            s_max = jnp.max(scores, axis=-1, keepdims=True)
            p = jnp.exp(scores - s_max)
            denom = jnp.sum(p, axis=-1, keepdims=True)
            attn = p * pl.reciprocal(denom, approx=True)                 # (qb, S)

            attn_ref[0, h] = attn.astype(attn_ref.dtype)

            ctx = jnp.dot(attn.astype(jnp.bfloat16), v_h,
                          preferred_element_type=jnp.float32)            # (qb, dv)
            ctx_parts.append(ctx.astype(jnp.bfloat16))

        blk = ctx_parts[0] if head_group == 1 else jnp.concatenate(ctx_parts, axis=-1)
        ctx_ref[:, g0 * d_v:(g0 + head_group) * d_v] = blk

    # ---- output projection: one big matmul over all heads.
    proj = jnp.dot(ctx_ref[...], wfc_ref[...],
                   preferred_element_type=jnp.float32)                   # (qb, D) f32

    # ---- residual + LayerNorm (f32)
    y = x_q + proj
    mean = jnp.mean(y, axis=-1, keepdims=True)
    centered = y - mean
    var = jnp.mean(centered * centered, axis=-1, keepdims=True)
    inv_std = lax.rsqrt(var + jnp.float32(eps))
    out_ref[0] = (centered * inv_std) * gamma_ref[...] + beta_ref[...]


def _vmem_capacity_bytes():
    try:
        info = pltpu.get_tpu_info()
        cap = getattr(info, "vmem_capacity_bytes", None)
        if cap:
            return int(cap)
    except Exception:
        pass
    return 64 * 1024 * 1024   # conservative (v7x-sized) fallback


def _vmem_estimate(qb, S, D, H, d_k, d_v, attn_bytes):
    """Conservative per-step VMEM accounting (assumes double-buffering everywhere)."""
    b = 0
    b += 2 * qb * D * 4                                   # q input block (f32)
    b += 2 * 2 * S * D * 2                                # K + V input blocks (bf16)
    b += 2 * qb * S * 1                                   # mask block (int8)
    b += 2 * 2 * (D * H * d_k + D * H * d_v) * 2          # W_Q,W_K + W_V,W_fc (bf16)
    b += 2 * 2 * D * 4                                    # gamma, beta
    b += 2 * qb * D * 4                                   # out block (f32)
    b += 2 * H * qb * S * attn_bytes                      # attn output block
    b += (S * H * d_k + S * H * d_v + qb * H * d_k + qb * H * d_v) * 2   # scratch
    return b


def _head_group(d_v, n_heads):
    """Largest head group whose ctx store is lane-dense (>=128 lanes or full width)."""
    if d_v >= 128 or 128 % d_v != 0:
        return 1
    g = min(128 // d_v, n_heads)
    while g > 1 and n_heads % g != 0:
        g //= 2
    return max(g, 1)


def _build_pallas_call(batch, s_pad, seq_len, d_model, n_heads, d_k, d_v,
                       q_block, head_group, eps, attn_dtype, vmem_limit,
                       single_buffer_constants):
    n_q = s_pad // q_block
    const_kw = {}
    if single_buffer_constants:
        # Constant-index blocks: one DMA total, no need for a second buffer.
        const_kw = dict(pipeline_mode=pl.Buffered(1))

    q_spec = pl.BlockSpec((1, q_block, d_model), lambda b, qi: (b, qi, 0))
    kv_spec = pl.BlockSpec((1, seq_len, d_model), lambda b, qi: (b, 0, 0), **const_kw)
    mask_spec = pl.BlockSpec((1, q_block, seq_len), lambda b, qi: (b, qi, 0))
    wqk_spec = pl.BlockSpec((d_model, n_heads * d_k), lambda b, qi: (0, 0), **const_kw)
    wv_spec = pl.BlockSpec((d_model, n_heads * d_v), lambda b, qi: (0, 0), **const_kw)
    wfc_spec = pl.BlockSpec((n_heads * d_v, d_model), lambda b, qi: (0, 0), **const_kw)
    ln_spec = pl.BlockSpec((1, d_model), lambda b, qi: (0, 0), **const_kw)

    kernel = functools.partial(
        _mha_kernel, n_heads=n_heads, d_k=d_k, d_v=d_v,
        head_group=head_group, eps=eps)

    return pl.pallas_call(
        kernel,
        out_shape=(
            jax.ShapeDtypeStruct((batch, s_pad, d_model), jnp.float32),
            jax.ShapeDtypeStruct((batch, n_heads, s_pad, seq_len), attn_dtype),
        ),
        grid_spec=pltpu.PrefetchScalarGridSpec(
            num_scalar_prefetch=0,
            grid=(batch, n_q),
            in_specs=[q_spec, kv_spec, kv_spec, mask_spec,
                      wqk_spec, wqk_spec, wv_spec, wfc_spec,
                      ln_spec, ln_spec],
            out_specs=[
                pl.BlockSpec((1, q_block, d_model), lambda b, qi: (b, qi, 0)),
                pl.BlockSpec((1, n_heads, q_block, seq_len),
                             lambda b, qi: (b, 0, qi, 0)),
            ],
            scratch_shapes=[
                pltpu.VMEM((seq_len, n_heads * d_k), jnp.bfloat16),   # K proj
                pltpu.VMEM((seq_len, n_heads * d_v), jnp.bfloat16),   # V proj
                pltpu.VMEM((q_block, n_heads * d_k), jnp.bfloat16),   # Q proj
                pltpu.VMEM((q_block, n_heads * d_v), jnp.bfloat16),   # ctx (all heads)
            ],
        ),
        compiler_params=pltpu.CompilerParams(
            dimension_semantics=("parallel", "arbitrary"),
            vmem_limit_bytes=vmem_limit),
    )


def multi_head_attention(input_q, input_k, input_v, attn_mask,
                         w_q, w_k, w_v, w_fc, gamma, beta,
                         *, n_heads, d_k, d_v, eps=1e-5, q_block=None,
                         attn_dtype=jnp.bfloat16):
    batch, seq_len, d_model = input_q.shape
    attn_bytes = jnp.dtype(attn_dtype).itemsize

    # ---- per-generation sizing: derive q_block + vmem limit from real VMEM capacity.
    vmem_cap = _vmem_capacity_bytes()
    budget = int(0.72 * vmem_cap)
    if q_block is None:
        candidates = [c for c in (512, 256, 128, 64) if c <= seq_len]
        if not candidates:
            q_block = seq_len
        else:
            q_block = candidates[-1]
            for c in candidates:
                if _vmem_estimate(c, seq_len, d_model, n_heads, d_k, d_v,
                                  attn_bytes) <= budget:
                    q_block = c
                    break
    q_block = max(1, min(q_block, seq_len))

    n_q = pl.cdiv(seq_len, q_block)
    s_pad = n_q * q_block

    est = _vmem_estimate(q_block, seq_len, d_model, n_heads, d_k, d_v, attn_bytes)
    vmem_limit = int(min(vmem_cap - 6 * 1024 * 1024,
                         max(est + 8 * 1024 * 1024, 32 * 1024 * 1024)))
    vmem_limit = max(vmem_limit, 16 * 1024 * 1024)

    head_group = _head_group(d_v, n_heads)

    # ---- host-side casts: bf16 weights and K/V inputs (Q stays f32 for residual/LN).
    w_q_b = w_q.astype(jnp.bfloat16)
    w_k_b = w_k.astype(jnp.bfloat16)
    w_v_b = w_v.astype(jnp.bfloat16)
    w_fc_b = w_fc.astype(jnp.bfloat16)
    k_in_b = input_k.astype(jnp.bfloat16)
    v_in_b = input_v.astype(jnp.bfloat16)
    gamma2d = gamma.reshape(1, d_model).astype(jnp.float32)
    beta2d = beta.reshape(1, d_model).astype(jnp.float32)
    mask_i8 = (attn_mask != 0).astype(jnp.int8)

    # ---- ragged seq: pad the query dim (not a full-seq fallback), slice off after.
    q_in = input_q.astype(jnp.float32)
    if s_pad != seq_len:
        pad = s_pad - seq_len
        q_in = jnp.pad(q_in, ((0, 0), (0, pad), (0, 0)))
        mask_i8 = jnp.pad(mask_i8, ((0, 0), (0, pad), (0, 0)))

    args = (q_in, k_in_b, v_in_b, mask_i8,
            w_q_b, w_k_b, w_v_b, w_fc_b, gamma2d, beta2d)

    def run(single_buffer_constants):
        call = _build_pallas_call(batch, s_pad, seq_len, d_model, n_heads,
                                  d_k, d_v, q_block, head_group, eps,
                                  attn_dtype, vmem_limit,
                                  single_buffer_constants)
        return call(*args)

    try:
        out, attn = run(True)
    except Exception:
        # TODO(synk): remove fallback once pipeline_mode=pl.Buffered(1) is
        # guaranteed supported on all deployed JAX versions.
        out, attn = run(False)

    if s_pad != seq_len:
        out = out[:, :seq_len]
        attn = attn[:, :, :seq_len]
    return out, attn


def _reference(input_q, input_k, input_v, attn_mask,
               w_q, w_k, w_v, w_fc, gamma, beta,
               *, n_heads, d_k, d_v, eps=1e-5):
    """Plain-JAX reference mirroring the PyTorch module semantics (f32)."""
    batch, seq_len, d_model = input_q.shape
    Q = (input_q @ w_q).reshape(batch, seq_len, n_heads, d_k).transpose(0, 2, 1, 3)
    K = (input_k @ w_k).reshape(batch, seq_len, n_heads, d_k).transpose(0, 2, 1, 3)
    V = (input_v @ w_v).reshape(batch, seq_len, n_heads, d_v).transpose(0, 2, 1, 3)
    scores = jnp.einsum('bhqd,bhkd->bhqk', Q, K) / jnp.sqrt(jnp.float32(d_k))
    mask = attn_mask[:, None, :, :] > 0
    scores = jnp.where(mask, -1000000000.0, scores)
    attn = jax.nn.softmax(scores, axis=-1)
    prob = jnp.einsum('bhqk,bhkd->bhqd', attn, V)
    prob = prob.transpose(0, 2, 1, 3).reshape(batch, seq_len, n_heads * d_v)
    output = prob @ w_fc
    y = input_q + output
    mean = jnp.mean(y, axis=-1, keepdims=True)
    var = jnp.mean((y - mean) ** 2, axis=-1, keepdims=True)
    normed = (y - mean) / jnp.sqrt(var + eps)
    return normed * gamma + beta, attn


if __name__ == "__main__":
    # Small deterministic config
    batch, seq_len = 2, 8
    d_model, d_k, d_v, n_heads = 32, 8, 8, 4

    key = jax.random.PRNGKey(0)
    kq, kk, kv, kwq, kwk, kwv, kwfc = jax.random.split(key, 7)

    input_q = jax.random.normal(kq, (batch, seq_len, d_model), dtype=jnp.float32)
    input_k = input_q  # self-attention style usage
    input_v = input_q

    # Causal-style mask: 1 where attention is disallowed (upper triangle).
    base_mask = jnp.triu(jnp.ones((seq_len, seq_len), dtype=jnp.int32), k=1)
    attn_mask = jnp.broadcast_to(base_mask, (batch, seq_len, seq_len))

    scale = 0.1
    w_q = scale * jax.random.normal(kwq, (d_model, n_heads * d_k), dtype=jnp.float32)
    w_k = scale * jax.random.normal(kwk, (d_model, n_heads * d_k), dtype=jnp.float32)
    w_v = scale * jax.random.normal(kwv, (d_model, n_heads * d_v), dtype=jnp.float32)
    w_fc = scale * jax.random.normal(kwfc, (n_heads * d_v, d_model), dtype=jnp.float32)
    gamma = jnp.ones((d_model,), dtype=jnp.float32)
    beta = jnp.zeros((d_model,), dtype=jnp.float32)

    out, attn = multi_head_attention(
        input_q, input_k, input_v, attn_mask,
        w_q, w_k, w_v, w_fc, gamma, beta,
        n_heads=n_heads, d_k=d_k, d_v=d_v)
    out = jax.block_until_ready(out)
    attn = jax.block_until_ready(attn)

    ref_out, ref_attn = _reference(
        input_q, input_k, input_v, attn_mask,
        w_q, w_k, w_v, w_fc, gamma, beta,
        n_heads=n_heads, d_k=d_k, d_v=d_v)

    # bf16 matmul inputs, bf16 attn storage, approx reciprocal -> loose-ish tolerance.
    assert jnp.allclose(out, ref_out, atol=3e-2, rtol=3e-2), "output mismatch"
    assert jnp.allclose(attn.astype(jnp.float32), ref_attn,
                        atol=2e-2, rtol=2e-2), "attn mismatch"

    print("KERNEL_OK")
</pallas_src>

<mosaic_0001>
module attributes {stable_mosaic.version = 11 : i64} {
  func.func @_mha_kernel(%arg0: i32, %arg1: i32, %arg2: memref<1x8x32xf32, #tpu.memory_space<vmem>>, %arg3: memref<1x8x32xbf16, #tpu.memory_space<vmem>>, %arg4: memref<1x8x32xbf16, #tpu.memory_space<vmem>>, %arg5: memref<1x8x8xi8, #tpu.memory_space<vmem>>, %arg6: memref<32x32xbf16, #tpu.memory_space<vmem>>, %arg7: memref<32x32xbf16, #tpu.memory_space<vmem>>, %arg8: memref<32x32xbf16, #tpu.memory_space<vmem>>, %arg9: memref<32x32xbf16, #tpu.memory_space<vmem>>, %arg10: memref<1x32xf32, #tpu.memory_space<vmem>>, %arg11: memref<1x32xf32, #tpu.memory_space<vmem>>, %arg12: memref<1x8x32xf32, #tpu.memory_space<vmem>>, %arg13: memref<1x4x8x8xbf16, #tpu.memory_space<vmem>>, %arg14: memref<8x32xbf16, #tpu.memory_space<vmem>>, %arg15: memref<8x32xbf16, #tpu.memory_space<vmem>>, %arg16: memref<8x32xbf16, #tpu.memory_space<vmem>>, %arg17: memref<8x32xbf16, #tpu.memory_space<vmem>>) attributes {dimension_semantics = [#tpu.dimension_semantics<parallel>, #tpu.dimension_semantics<arbitrary>], iteration_bounds = array<i64: 2, 1>, scalar_prefetch = 0 : i64, scratch_operands = 4 : i64, tpu.core_type = #tpu.core_type<tc>, window_params = [{transform_indices = @transform_0, window_bounds = array<i64: 1, 8, 32>}, {pipeline_mode = #tpu.pipeline_mode<synchronous>, transform_indices = @transform_1, window_bounds = array<i64: 1, 8, 32>}, {pipeline_mode = #tpu.pipeline_mode<synchronous>, transform_indices = @transform_2, window_bounds = array<i64: 1, 8, 32>}, {transform_indices = @transform_3, window_bounds = array<i64: 1, 8, 8>}, {pipeline_mode = #tpu.pipeline_mode<synchronous>, transform_indices = @transform_4, window_bounds = array<i64: 32, 32>}, {pipeline_mode = #tpu.pipeline_mode<synchronous>, transform_indices = @transform_5, window_bounds = array<i64: 32, 32>}, {pipeline_mode = #tpu.pipeline_mode<synchronous>, transform_indices = @transform_6, window_bounds = array<i64: 32, 32>}, {pipeline_mode = #tpu.pipeline_mode<synchronous>, transform_indices = @transform_7, window_bounds = array<i64: 32, 32>}, {pipeline_mode = #tpu.pipeline_mode<synchronous>, transform_indices = @transform_8, window_bounds = array<i64: 1, 32>}, {pipeline_mode = #tpu.pipeline_mode<synchronous>, transform_indices = @transform_9, window_bounds = array<i64: 1, 32>}, {transform_indices = @transform_10, window_bounds = array<i64: 1, 8, 32>}, {transform_indices = @transform_11, window_bounds = array<i64: 1, 4, 8, 8>}]} {
    %c0_i32 = arith.constant 0 : i32
    %0 = arith.cmpi eq, %arg1, %c0_i32 : i32
    %1 = arith.extui %0 : i1 to i32
    %c0_i32_0 = arith.constant 0 : i32
    %2 = arith.cmpi ne, %1, %c0_i32_0 : i32
    scf.if %2 {
      %c0_84 = arith.constant 0 : index
      %c0_85 = arith.constant 0 : index
      %c0_86 = arith.constant 0 : index
      %139 = vector.load %arg3[%c0_84, %c0_85, %c0_86] : memref<1x8x32xbf16, #tpu.memory_space<vmem>>, vector<1x8x32xbf16>
      %140 = vector.shape_cast %139 : vector<1x8x32xbf16> to vector<8x32xbf16>
      %c0_87 = arith.constant 0 : index
      %c0_88 = arith.constant 0 : index
      %141 = vector.load %arg7[%c0_87, %c0_88] : memref<32x32xbf16, #tpu.memory_space<vmem>>, vector<32x32xbf16>
      %cst_89 = arith.constant dense<0.000000e+00> : vector<8x32xf32>
      %142 = tpu.matmul %140, %141, %cst_89 {dimension_numbers = #tpu.dot_dimension_numbers<[1], [0], [0], [1], [0, 0, 1, 1], [], []>} : vector<8x32xbf16>, vector<32x32xbf16>, vector<8x32xf32> -> vector<8x32xf32>
      %143 = arith.truncf %142 : vector<8x32xf32> to vector<8x32xbf16>
      %c0_90 = arith.constant 0 : index
      %c0_91 = arith.constant 0 : index
      %144 = vector.load %arg14[%c0_90, %c0_91] : memref<8x32xbf16, #tpu.memory_space<vmem>>, vector<8x32xbf16>
      tpu.vector_store %arg14[%c0_90, %c0_91], %143 {strides = array<i32>} : memref<8x32xbf16, #tpu.memory_space<vmem>>, vector<8x32xbf16>,
      %c0_92 = arith.constant 0 : index
      %c0_93 = arith.constant 0 : index
      %c0_94 = arith.constant 0 : index
      %145 = vector.load %arg4[%c0_92, %c0_93, %c0_94] : memref<1x8x32xbf16, #tpu.memory_space<vmem>>, vector<1x8x32xbf16>
      %146 = vector.shape_cast %145 : vector<1x8x32xbf16> to vector<8x32xbf16>
      %c0_95 = arith.constant 0 : index
      %c0_96 = arith.constant 0 : index
      %147 = vector.load %arg8[%c0_95, %c0_96] : memref<32x32xbf16, #tpu.memory_space<vmem>>, vector<32x32xbf16>
      %cst_97 = arith.constant dense<0.000000e+00> : vector<8x32xf32>
      %148 = tpu.matmul %146, %147, %cst_97 {dimension_numbers = #tpu.dot_dimension_numbers<[1], [0], [0], [1], [0, 0, 1, 1], [], []>} : vector<8x32xbf16>, vector<32x32xbf16>, vector<8x32xf32> -> vector<8x32xf32>
      %149 = arith.truncf %148 : vector<8x32xf32> to vector<8x32xbf16>
      %c0_98 = arith.constant 0 : index
      %c0_99 = arith.constant 0 : index
      %150 = vector.load %arg15[%c0_98, %c0_99] : memref<8x32xbf16, #tpu.memory_space<vmem>>, vector<8x32xbf16>
      tpu.vector_store %arg15[%c0_98, %c0_99], %149 {strides = array<i32>} : memref<8x32xbf16, #tpu.memory_space<vmem>>, vector<8x32xbf16>,
    } else {
    }
    %c0 = arith.constant 0 : index
    %c0_1 = arith.constant 0 : index
    %c0_2 = arith.constant 0 : index
    %3 = vector.load %arg2[%c0, %c0_1, %c0_2] : memref<1x8x32xf32, #tpu.memory_space<vmem>>, vector<1x8x32xf32>
    %4 = vector.shape_cast %3 : vector<1x8x32xf32> to vector<8x32xf32>
    %c0_3 = arith.constant 0 : index
    %c0_4 = arith.constant 0 : index
    %c0_5 = arith.constant 0 : index
    %5 = vector.load %arg5[%c0_3, %c0_4, %c0_5] : memref<1x8x8xi8, #tpu.memory_space<vmem>>, vector<1x8x8xi8>
    %6 = vector.shape_cast %5 : vector<1x8x8xi8> to vector<8x8xi8>
    %c0_i8 = arith.constant 0 : i8
    %7 = vector.broadcast %c0_i8 : i8 to vector<8x8xi8>
    %8 = arith.cmpi ne, %6, %7 : vector<8x8xi8>
    %9 = arith.truncf %4 : vector<8x32xf32> to vector<8x32xbf16>
    %c0_6 = arith.constant 0 : index
    %c0_7 = arith.constant 0 : index
    %10 = vector.load %arg6[%c0_6, %c0_7] : memref<32x32xbf16, #tpu.memory_space<vmem>>, vector<32x32xbf16>
    %cst = arith.constant dense<0.000000e+00> : vector<8x32xf32>
    %11 = tpu.matmul %9, %10, %cst {dimension_numbers = #tpu.dot_dimension_numbers<[1], [0], [0], [1], [0, 0, 1, 1], [], []>} : vector<8x32xbf16>, vector<32x32xbf16>, vector<8x32xf32> -> vector<8x32xf32>
    %cst_8 = arith.constant 0.353553385 : f32
    %12 = vector.broadcast %cst_8 : f32 to vector<8x32xf32>
    %13 = arith.mulf %11, %12 : vector<8x32xf32>
    %14 = arith.truncf %13 : vector<8x32xf32> to vector<8x32xbf16>
    %c0_9 = arith.constant 0 : index
    %c0_10 = arith.constant 0 : index
    %15 = vector.load %arg16[%c0_9, %c0_10] : memref<8x32xbf16, #tpu.memory_space<vmem>>, vector<8x32xbf16>
    tpu.vector_store %arg16[%c0_9, %c0_10], %14 {strides = array<i32>} : memref<8x32xbf16, #tpu.memory_space<vmem>>, vector<8x32xbf16>,
    %c0_11 = arith.constant 0 : index
    %c0_12 = arith.constant 0 : index
    %16 = vector.load %arg16[%c0_11, %c0_12] : memref<8x32xbf16, #tpu.memory_space<vmem>>, vector<8x8xbf16>
    %c0_13 = arith.constant 0 : index
    %c0_14 = arith.constant 0 : index
    %17 = vector.load %arg14[%c0_13, %c0_14] : memref<8x32xbf16, #tpu.memory_space<vmem>>, vector<8x8xbf16>
    %c0_15 = arith.constant 0 : index
    %c0_16 = arith.constant 0 : index
    %18 = vector.load %arg15[%c0_15, %c0_16] : memref<8x32xbf16, #tpu.memory_space<vmem>>, vector<8x8xbf16>
    %cst_17 = arith.constant dense<0.000000e+00> : vector<8x8xf32>
    %19 = tpu.matmul %16, %17, %cst_17 {dimension_numbers = #tpu.dot_dimension_numbers<[1], [1], [0], [0], [0, 0, 1, 0], [], []>} : vector<8x8xbf16>, vector<8x8xbf16>, vector<8x8xf32> -> vector<8x8xf32>
    %cst_18 = arith.constant -1.000000e+09 : f32
    %20 = vector.broadcast %cst_18 : f32 to vector<8x8xf32>
    %21 = arith.select %8, %20, %19 : vector<8x8xi1>, vector<8x8xf32>
    %cst_19 = arith.constant dense<0xFF800000> : vector<8xf32>
    %22 = vector.multi_reduction <maximumf>, %21, %cst_19 [1] : vector<8x8xf32> to vector<8xf32>
    %23 = vector.shape_cast %22 : vector<8xf32> to vector<8x1xf32>
    %24 = vector.broadcast %23 : vector<8x1xf32> to vector<8x8xf32>
    %25 = arith.subf %21, %24 : vector<8x8xf32>
    %26 = math.exp %25 : vector<8x8xf32>
    %cst_20 = arith.constant dense<0.000000e+00> : vector<8xf32>
    %27 = vector.multi_reduction <add>, %26, %cst_20 [1] : vector<8x8xf32> to vector<8xf32>
    %28 = vector.shape_cast %27 : vector<8xf32> to vector<8x1xf32>
    %29 = tpu.reciprocal %28 {approx = true} : vector<8x1xf32> -> vector<8x1xf32>
    %30 = vector.broadcast %29 : vector<8x1xf32> to vector<8x8xf32>
    %31 = arith.mulf %26, %30 : vector<8x8xf32>
    %32 = arith.truncf %31 : vector<8x8xf32> to vector<8x8xbf16>
    %c0_21 = arith.constant 0 : index
    %c0_22 = arith.constant 0 : index
    %c0_23 = arith.constant 0 : index
    %c0_24 = arith.constant 0 : index
    %33 = vector.load %arg13[%c0_21, %c0_22, %c0_23, %c0_24] : memref<1x4x8x8xbf16, #tpu.memory_space<vmem>>, vector<1x1x8x8xbf16>
    %34 = vector.shape_cast %33 : vector<1x1x8x8xbf16> to vector<8x8xbf16>
    %35 = vector.shape_cast %32 : vector<8x8xbf16> to vector<1x1x8x8xbf16>
    tpu.vector_store %arg13[%c0_21, %c0_22, %c0_23, %c0_24], %35 {strides = array<i32>} : memref<1x4x8x8xbf16, #tpu.memory_space<vmem>>, vector<1x1x8x8xbf16>,
    %36 = arith.truncf %31 : vector<8x8xf32> to vector<8x8xbf16>
    %cst_25 = arith.constant dense<0.000000e+00> : vector<8x8xf32>
    %37 = tpu.matmul %36, %18, %cst_25 {dimension_numbers = #tpu.dot_dimension_numbers<[1], [0], [0], [1], [0, 0, 1, 1], [], []>} : vector<8x8xbf16>, vector<8x8xbf16>, vector<8x8xf32> -> vector<8x8xf32>
    %38 = arith.truncf %37 : vector<8x8xf32> to vector<8x8xbf16>
    %c0_26 = arith.constant 0 : index
    %c8 = arith.constant 8 : index
    %39 = vector.load %arg16[%c0_26, %c8] : memref<8x32xbf16, #tpu.memory_space<vmem>>, vector<8x8xbf16>
    %c0_27 = arith.constant 0 : index
    %c8_28 = arith.constant 8 : index
    %40 = vector.load %arg14[%c0_27, %c8_28] : memref<8x32xbf16, #tpu.memory_space<vmem>>, vector<8x8xbf16>
    %c0_29 = arith.constant 0 : index
    %c8_30 = arith.constant 8 : index
    %41 = vector.load %arg15[%c0_29, %c8_30] : memref<8x32xbf16, #tpu.memory_space<vmem>>, vector<8x8xbf16>
    %cst_31 = arith.constant dense<0.000000e+00> : vector<8x8xf32>
    %42 = tpu.matmul %39, %40, %cst_31 {dimension_numbers = #tpu.dot_dimension_numbers<[1], [1], [0], [0], [0, 0, 1, 0], [], []>} : vector<8x8xbf16>, vector<8x8xbf16>, vector<8x8xf32> -> vector<8x8xf32>
    %cst_32 = arith.constant -1.000000e+09 : f32
    %43 = vector.broadcast %cst_32 : f32 to vector<8x8xf32>
    %44 = arith.select %8, %43, %42 : vector<8x8xi1>, vector<8x8xf32>
    %cst_33 = arith.constant dense<0xFF800000> : vector<8xf32>
    %45 = vector.multi_reduction <maximumf>, %44, %cst_33 [1] : vector<8x8xf32> to vector<8xf32>
    %46 = vector.shape_cast %45 : vector<8xf32> to vector<8x1xf32>
    %47 = vector.broadcast %46 : vector<8x1xf32> to vector<8x8xf32>
    %48 = arith.subf %44, %47 : vector<8x8xf32>
    %49 = math.exp %48 : vector<8x8xf32>
    %cst_34 = arith.constant dense<0.000000e+00> : vector<8xf32>
    %50 = vector.multi_reduction <add>, %49, %cst_34 [1] : vector<8x8xf32> to vector<8xf32>
    %51 = vector.shape_cast %50 : vector<8xf32> to vector<8x1xf32>
    %52 = tpu.reciprocal %51 {approx = true} : vector<8x1xf32> -> vector<8x1xf32>
    %53 = vector.broadcast %52 : vector<8x1xf32> to vector<8x8xf32>
    %54 = arith.mulf %49, %53 : vector<8x8xf32>
    %55 = arith.truncf %54 : vector<8x8xf32> to vector<8x8xbf16>
    %c0_35 = arith.constant 0 : index
    %c1 = arith.constant 1 : index
    %c0_36 = arith.constant 0 : index
    %c0_37 = arith.constant 0 : index
    %56 = vector.load %arg13[%c0_35, %c1, %c0_36, %c0_37] : memref<1x4x8x8xbf16, #tpu.memory_space<vmem>>, vector<1x1x8x8xbf16>
    %57 = vector.shape_cast %56 : vector<1x1x8x8xbf16> to vector<8x8xbf16>
    %58 = vector.shape_cast %55 : vector<8x8xbf16> to vector<1x1x8x8xbf16>
    tpu.vector_store %arg13[%c0_35, %c1, %c0_36, %c0_37], %58 {strides = array<i32>} : memref<1x4x8x8xbf16, #tpu.memory_space<vmem>>, vector<1x1x8x8xbf16>,
    %59 = arith.truncf %54 : vector<8x8xf32> to vector<8x8xbf16>
    %cst_38 = arith.constant dense<0.000000e+00> : vector<8x8xf32>
    %60 = tpu.matmul %59, %41, %cst_38 {dimension_numbers = #tpu.dot_dimension_numbers<[1], [0], [0], [1], [0, 0, 1, 1], [], []>} : vector<8x8xbf16>, vector<8x8xbf16>, vector<8x8xf32> -> vector<8x8xf32>
    %61 = arith.truncf %60 : vector<8x8xf32> to vector<8x8xbf16>
    %c0_39 = arith.constant 0 : index
    %c16 = arith.constant 16 : index
    %62 = vector.load %arg16[%c0_39, %c16] : memref<8x32xbf16, #tpu.memory_space<vmem>>, vector<8x8xbf16>
    %c0_40 = arith.constant 0 : index
    %c16_41 = arith.constant 16 : index
    %63 = vector.load %arg14[%c0_40, %c16_41] : memref<8x32xbf16, #tpu.memory_space<vmem>>, vector<8x8xbf16>
    %c0_42 = arith.constant 0 : index
    %c16_43 = arith.constant 16 : index
    %64 = vector.load %arg15[%c0_42, %c16_43] : memref<8x32xbf16, #tpu.memory_space<vmem>>, vector<8x8xbf16>
    %cst_44 = arith.constant dense<0.000000e+00> : vector<8x8xf32>
    %65 = tpu.matmul %62, %63, %cst_44 {dimension_numbers = #tpu.dot_dimension_numbers<[1], [1], [0], [0], [0, 0, 1, 0], [], []>} : vector<8x8xbf16>, vector<8x8xbf16>, vector<8x8xf32> -> vector<8x8xf32>
    %cst_45 = arith.constant -1.000000e+09 : f32
    %66 = vector.broadcast %cst_45 : f32 to vector<8x8xf32>
    %67 = arith.select %8, %66, %65 : vector<8x8xi1>, vector<8x8xf32>
    %cst_46 = arith.constant dense<0xFF800000> : vector<8xf32>
    %68 = vector.multi_reduction <maximumf>, %67, %cst_46 [1] : vector<8x8xf32> to vector<8xf32>
    %69 = vector.shape_cast %68 : vector<8xf32> to vector<8x1xf32>
    %70 = vector.broadcast %69 : vector<8x1xf32> to vector<8x8xf32>
    %71 = arith.subf %67, %70 : vector<8x8xf32>
    %72 = math.exp %71 : vector<8x8xf32>
    %cst_47 = arith.constant dense<0.000000e+00> : vector<8xf32>
    %73 = vector.multi_reduction <add>, %72, %cst_47 [1] : vector<8x8xf32> to vector<8xf32>
    %74 = vector.shape_cast %73 : vector<8xf32> to vector<8x1xf32>
    %75 = tpu.reciprocal %74 {approx = true} : vector<8x1xf32> -> vector<8x1xf32>
    %76 = vector.broadcast %75 : vector<8x1xf32> to vector<8x8xf32>
    %77 = arith.mulf %72, %76 : vector<8x8xf32>
    %78 = arith.truncf %77 : vector<8x8xf32> to vector<8x8xbf16>
    %c0_48 = arith.constant 0 : index
    %c2 = arith.constant 2 : index
    %c0_49 = arith.constant 0 : index
    %c0_50 = arith.constant 0 : index
    %79 = vector.load %arg13[%c0_48, %c2, %c0_49, %c0_50] : memref<1x4x8x8xbf16, #tpu.memory_space<vmem>>, vector<1x1x8x8xbf16>
    %80 = vector.shape_cast %79 : vector<1x1x8x8xbf16> to vector<8x8xbf16>
    %81 = vector.shape_cast %78 : vector<8x8xbf16> to vector<1x1x8x8xbf16>
    tpu.vector_store %arg13[%c0_48, %c2, %c0_49, %c0_50], %81 {strides = array<i32>} : memref<1x4x8x8xbf16, #tpu.memory_space<vmem>>, vector<1x1x8x8xbf16>,
    %82 = arith.truncf %77 : vector<8x8xf32> to vector<8x8xbf16>
    %cst_51 = arith.constant dense<0.000000e+00> : vector<8x8xf32>
    %83 = tpu.matmul %82, %64, %cst_51 {dimension_numbers = #tpu.dot_dimension_numbers<[1], [0], [0], [1], [0, 0, 1, 1], [], []>} : vector<8x8xbf16>, vector<8x8xbf16>, vector<8x8xf32> -> vector<8x8xf32>
    %84 = arith.truncf %83 : vector<8x8xf32> to vector<8x8xbf16>
    %c0_52 = arith.constant 0 : index
    %c24 = arith.constant 24 : index
    %85 = vector.load %arg16[%c0_52, %c24] : memref<8x32xbf16, #tpu.memory_space<vmem>>, vector<8x8xbf16>
    %c0_53 = arith.constant 0 : index
    %c24_54 = arith.constant 24 : index
    %86 = vector.load %arg14[%c0_53, %c24_54] : memref<8x32xbf16, #tpu.memory_space<vmem>>, vector<8x8xbf16>
    %c0_55 = arith.constant 0 : index
    %c24_56 = arith.constant 24 : index
    %87 = vector.load %arg15[%c0_55, %c24_56] : memref<8x32xbf16, #tpu.memory_space<vmem>>, vector<8x8xbf16>
    %cst_57 = arith.constant dense<0.000000e+00> : vector<8x8xf32>
    %88 = tpu.matmul %85, %86, %cst_57 {dimension_numbers = #tpu.dot_dimension_numbers<[1], [1], [0], [0], [0, 0, 1, 0], [], []>} : vector<8x8xbf16>, vector<8x8xbf16>, vector<8x8xf32> -> vector<8x8xf32>
    %cst_58 = arith.constant -1.000000e+09 : f32
    %89 = vector.broadcast %cst_58 : f32 to vector<8x8xf32>
    %90 = arith.select %8, %89, %88 : vector<8x8xi1>, vector<8x8xf32>
    %cst_59 = arith.constant dense<0xFF800000> : vector<8xf32>
    %91 = vector.multi_reduction <maximumf>, %90, %cst_59 [1] : vector<8x8xf32> to vector<8xf32>
    %92 = vector.shape_cast %91 : vector<8xf32> to vector<8x1xf32>
    %93 = vector.broadcast %92 : vector<8x1xf32> to vector<8x8xf32>
    %94 = arith.subf %90, %93 : vector<8x8xf32>
    %95 = math.exp %94 : vector<8x8xf32>
    %cst_60 = arith.constant dense<0.000000e+00> : vector<8xf32>
    %96 = vector.multi_reduction <add>, %95, %cst_60 [1] : vector<8x8xf32> to vector<8xf32>
    %97 = vector.shape_cast %96 : vector<8xf32> to vector<8x1xf32>
    %98 = tpu.reciprocal %97 {approx = true} : vector<8x1xf32> -> vector<8x1xf32>
    %99 = vector.broadcast %98 : vector<8x1xf32> to vector<8x8xf32>
    %100 = arith.mulf %95, %99 : vector<8x8xf32>
    %101 = arith.truncf %100 : vector<8x8xf32> to vector<8x8xbf16>
    %c0_61 = arith.constant 0 : index
    %c3 = arith.constant 3 : index
    %c0_62 = arith.constant 0 : index
    %c0_63 = arith.constant 0 : index
    %102 = vector.load %arg13[%c0_61, %c3, %c0_62, %c0_63] : memref<1x4x8x8xbf16, #tpu.memory_space<vmem>>, vector<1x1x8x8xbf16>
    %103 = vector.shape_cast %102 : vector<1x1x8x8xbf16> to vector<8x8xbf16>
    %104 = vector.shape_cast %101 : vector<8x8xbf16> to vector<1x1x8x8xbf16>
    tpu.vector_store %arg13[%c0_61, %c3, %c0_62, %c0_63], %104 {strides = array<i32>} : memref<1x4x8x8xbf16, #tpu.memory_space<vmem>>, vector<1x1x8x8xbf16>,
    %105 = arith.truncf %100 : vector<8x8xf32> to vector<8x8xbf16>
    %cst_64 = arith.constant dense<0.000000e+00> : vector<8x8xf32>
    %106 = tpu.matmul %105, %87, %cst_64 {dimension_numbers = #tpu.dot_dimension_numbers<[1], [0], [0], [1], [0, 0, 1, 1], [], []>} : vector<8x8xbf16>, vector<8x8xbf16>, vector<8x8xf32> -> vector<8x8xf32>
    %107 = arith.truncf %106 : vector<8x8xf32> to vector<8x8xbf16>
    %108 = tpu.concatenate %38, %61, %84, %107 in 1 : vector<8x8xbf16>, vector<8x8xbf16>, vector<8x8xbf16>, vector<8x8xbf16> -> vector<8x32xbf16>
    %c0_65 = arith.constant 0 : index
    %c0_66 = arith.constant 0 : index
    %109 = vector.load %arg17[%c0_65, %c0_66] : memref<8x32xbf16, #tpu.memory_space<vmem>>, vector<8x32xbf16>
    tpu.vector_store %arg17[%c0_65, %c0_66], %108 {strides = array<i32>} : memref<8x32xbf16, #tpu.memory_space<vmem>>, vector<8x32xbf16>,
    %c0_67 = arith.constant 0 : index
    %c0_68 = arith.constant 0 : index
    %110 = vector.load %arg17[%c0_67, %c0_68] : memref<8x32xbf16, #tpu.memory_space<vmem>>, vector<8x32xbf16>
    %c0_69 = arith.constant 0 : index
    %c0_70 = arith.constant 0 : index
    %111 = vector.load %arg9[%c0_69, %c0_70] : memref<32x32xbf16, #tpu.memory_space<vmem>>, vector<32x32xbf16>
    %cst_71 = arith.constant dense<0.000000e+00> : vector<8x32xf32>
    %112 = tpu.matmul %110, %111, %cst_71 {dimension_numbers = #tpu.dot_dimension_numbers<[1], [0], [0], [1], [0, 0, 1, 1], [], []>} : vector<8x32xbf16>, vector<32x32xbf16>, vector<8x32xf32> -> vector<8x32xf32>
    %113 = arith.addf %4, %112 : vector<8x32xf32>
    %cst_72 = arith.constant dense<0.000000e+00> : vector<8xf32>
    %114 = vector.multi_reduction <add>, %113, %cst_72 [1] : vector<8x32xf32> to vector<8xf32>
    %115 = vector.shape_cast %114 : vector<8xf32> to vector<8x1xf32>
    %cst_73 = arith.constant 3.200000e+01 : f32
    %116 = vector.broadcast %cst_73 : f32 to vector<8x1xf32>
    %117 = arith.divf %115, %116 : vector<8x1xf32>
    %118 = vector.broadcast %117 : vector<8x1xf32> to vector<8x32xf32>
    %119 = arith.subf %113, %118 : vector<8x32xf32>
    %120 = arith.mulf %119, %119 : vector<8x32xf32>
    %cst_74 = arith.constant dense<0.000000e+00> : vector<8xf32>
    %121 = vector.multi_reduction <add>, %120, %cst_74 [1] : vector<8x32xf32> to vector<8xf32>
    %122 = vector.shape_cast %121 : vector<8xf32> to vector<8x1xf32>
    %cst_75 = arith.constant 3.200000e+01 : f32
    %123 = vector.broadcast %cst_75 : f32 to vector<8x1xf32>
    %124 = arith.divf %122, %123 : vector<8x1xf32>
    %cst_76 = arith.constant 9.99999974E-6 : f32
    %125 = vector.broadcast %cst_76 : f32 to vector<8x1xf32>
    %126 = arith.addf %124, %125 : vector<8x1xf32>
    %127 = math.rsqrt %126 : vector<8x1xf32>
    %128 = vector.broadcast %127 : vector<8x1xf32> to vector<8x32xf32>
    %129 = arith.mulf %119, %128 : vector<8x32xf32>
    %c0_77 = arith.constant 0 : index
    %c0_78 = arith.constant 0 : index
    %130 = vector.load %arg10[%c0_77, %c0_78] : memref<1x32xf32, #tpu.memory_space<vmem>>, vector<1x32xf32>
    %131 = vector.broadcast %130 : vector<1x32xf32> to vector<8x32xf32>
    %132 = arith.mulf %129, %131 : vector<8x32xf32>
    %c0_79 = arith.constant 0 : index
    %c0_80 = arith.constant 0 : index
    %133 = vector.load %arg11[%c0_79, %c0_80] : memref<1x32xf32, #tpu.memory_space<vmem>>, vector<1x32xf32>
    %134 = vector.broadcast %133 : vector<1x32xf32> to vector<8x32xf32>
    %135 = arith.addf %132, %134 : vector<8x32xf32>
    %c0_81 = arith.constant 0 : index
    %c0_82 = arith.constant 0 : index
    %c0_83 = arith.constant 0 : index
    %136 = vector.load %arg12[%c0_81, %c0_82, %c0_83] : memref<1x8x32xf32, #tpu.memory_space<vmem>>, vector<1x8x32xf32>
    %137 = vector.shape_cast %136 : vector<1x8x32xf32> to vector<8x32xf32>
    %138 = vector.shape_cast %135 : vector<8x32xf32> to vector<1x8x32xf32>
    tpu.vector_store %arg12[%c0_81, %c0_82, %c0_83], %138 {strides = array<i32>} : memref<1x8x32xf32, #tpu.memory_space<vmem>>, vector<1x8x32xf32>,
    return
  }
  func.func @transform_0(%arg0: i32, %arg1: i32) -> (i32, i32, i32) {
    %c0_i32 = arith.constant 0 : i32
    %c0_i32_0 = arith.constant 0 : i32
    return %arg0, %arg1, %c0_i32 : i32, i32, i32
  }
  func.func @transform_1(%arg0: i32, %arg1: i32) -> (i32, i32, i32) {
    %c0_i32 = arith.constant 0 : i32
    %c0_i32_0 = arith.constant 0 : i32
    %c0_i32_1 = arith.constant 0 : i32
    return %arg0, %c0_i32, %c0_i32_0 : i32, i32, i32
  }
  func.func @transform_2(%arg0: i32, %arg1: i32) -> (i32, i32, i32) {
    %c0_i32 = arith.constant 0 : i32
    %c0_i32_0 = arith.constant 0 : i32
    %c0_i32_1 = arith.constant 0 : i32
    return %arg0, %c0_i32, %c0_i32_0 : i32, i32, i32
  }
  func.func @transform_3(%arg0: i32, %arg1: i32) -> (i32, i32, i32) {
    %c0_i32 = arith.constant 0 : i32
    %c0_i32_0 = arith.constant 0 : i32
    return %arg0, %arg1, %c0_i32 : i32, i32, i32
  }
  func.func @transform_4(%arg0: i32, %arg1: i32) -> (i32, i32) {
    %c0_i32 = arith.constant 0 : i32
    %c0_i32_0 = arith.constant 0 : i32
    %c0_i32_1 = arith.constant 0 : i32
    return %c0_i32, %c0_i32_0 : i32, i32
  }
  func.func @transform_5(%arg0: i32, %arg1: i32) -> (i32, i32) {
    %c0_i32 = arith.constant 0 : i32
    %c0_i32_0 = arith.constant 0 : i32
    %c0_i32_1 = arith.constant 0 : i32
    return %c0_i32, %c0_i32_0 : i32, i32
  }
  func.func @transform_6(%arg0: i32, %arg1: i32) -> (i32, i32) {
    %c0_i32 = arith.constant 0 : i32
    %c0_i32_0 = arith.constant 0 : i32
    %c0_i32_1 = arith.constant 0 : i32
    return %c0_i32, %c0_i32_0 : i32, i32
  }
  func.func @transform_7(%arg0: i32, %arg1: i32) -> (i32, i32) {
    %c0_i32 = arith.constant 0 : i32
    %c0_i32_0 = arith.constant 0 : i32
    %c0_i32_1 = arith.constant 0 : i32
    return %c0_i32, %c0_i32_0 : i32, i32
  }
  func.func @transform_8(%arg0: i32, %arg1: i32) -> (i32, i32) {
    %c0_i32 = arith.constant 0 : i32
    %c0_i32_0 = arith.constant 0 : i32
    %c0_i32_1 = arith.constant 0 : i32
    return %c0_i32, %c0_i32_0 : i32, i32
  }
  func.func @transform_9(%arg0: i32, %arg1: i32) -> (i32, i32) {
    %c0_i32 = arith.constant 0 : i32
    %c0_i32_0 = arith.constant 0 : i32
    %c0_i32_1 = arith.constant 0 : i32
    return %c0_i32, %c0_i32_0 : i32, i32
  }
  func.func @transform_10(%arg0: i32, %arg1: i32) -> (i32, i32, i32) {
    %c0_i32 = arith.constant 0 : i32
    %c0_i32_0 = arith.constant 0 : i32
    return %arg0, %arg1, %c0_i32 : i32, i32, i32
  }
  func.func @transform_11(%arg0: i32, %arg1: i32) -> (i32, i32, i32, i32) {
    %c0_i32 = arith.constant 0 : i32
    %c0_i32_0 = arith.constant 0 : i32
    %c0_i32_1 = arith.constant 0 : i32
    return %arg0, %c0_i32, %arg1, %c0_i32_0 : i32, i32, i32, i32
  }
}

module attributes {stable_mosaic.version = 11 : i64} {
  func.func @_mha_kernel(%arg0: i32, %arg1: i32, %arg2: memref<1x8x32xf32, #tpu.memory_space<vmem>>, %arg3: memref<1x8x32xbf16, #tpu.memory_space<vmem>>, %arg4: memref<1x8x32xbf16, #tpu.memory_space<vmem>>, %arg5: memref<1x8x8xi8, #tpu.memory_space<vmem>>, %arg6: memref<32x32xbf16, #tpu.memory_space<vmem>>, %arg7: memref<32x32xbf16, #tpu.memory_space<vmem>>, %arg8: memref<32x32xbf16, #tpu.memory_space<vmem>>, %arg9: memref<32x32xbf16, #tpu.memory_space<vmem>>, %arg10: memref<1x32xf32, #tpu.memory_space<vmem>>, %arg11: memref<1x32xf32, #tpu.memory_space<vmem>>, %arg12: memref<1x8x32xf32, #tpu.memory_space<vmem>>, %arg13: memref<1x4x8x8xbf16, #tpu.memory_space<vmem>>, %arg14: memref<8x32xbf16, #tpu.memory_space<vmem>>, %arg15: memref<8x32xbf16, #tpu.memory_space<vmem>>, %arg16: memref<8x32xbf16, #tpu.memory_space<vmem>>, %arg17: memref<8x32xbf16, #tpu.memory_space<vmem>>) attributes {dimension_semantics = [#tpu.dimension_semantics<parallel>, #tpu.dimension_semantics<arbitrary>], iteration_bounds = array<i64: 2, 1>, scalar_prefetch = 0 : i64, scratch_operands = 4 : i64, tpu.core_type = #tpu.core_type<tc>, window_params = [{transform_indices = @transform_0, window_bounds = array<i64: 1, 8, 32>}, {transform_indices = @transform_1, window_bounds = array<i64: 1, 8, 32>}, {transform_indices = @transform_2, window_bounds = array<i64: 1, 8, 32>}, {transform_indices = @transform_3, window_bounds = array<i64: 1, 8, 8>}, {pipeline_mode = #tpu.pipeline_mode<synchronous>, transform_indices = @transform_4, window_bounds = array<i64: 32, 32>}, {pipeline_mode = #tpu.pipeline_mode<synchronous>, transform_indices = @transform_5, window_bounds = array<i64: 32, 32>}, {pipeline_mode = #tpu.pipeline_mode<synchronous>, transform_indices = @transform_6, window_bounds = array<i64: 32, 32>}, {pipeline_mode = #tpu.pipeline_mode<synchronous>, transform_indices = @transform_7, window_bounds = array<i64: 32, 32>}, {pipeline_mode = #tpu.pipeline_mode<synchronous>, transform_indices = @transform_8, window_bounds = array<i64: 1, 32>}, {pipeline_mode = #tpu.pipeline_mode<synchronous>, transform_indices = @transform_9, window_bounds = array<i64: 1, 32>}, {transform_indices = @transform_10, window_bounds = array<i64: 1, 8, 32>}, {transform_indices = @transform_11, window_bounds = array<i64: 1, 4, 8, 8>}]} {
    %c0_i32 = arith.constant 0 : i32
    %0 = arith.cmpi eq, %arg1, %c0_i32 : i32
    %1 = arith.extui %0 : i1 to i32
    %c0_i32_0 = arith.constant 0 : i32
    %2 = arith.cmpi ne, %1, %c0_i32_0 : i32
    scf.if %2 {
      %c0_84 = arith.constant 0 : index
      %c0_85 = arith.constant 0 : index
      %c0_86 = arith.constant 0 : index
      %139 = vector.load %arg3[%c0_84, %c0_85, %c0_86] : memref<1x8x32xbf16, #tpu.memory_space<vmem>>, vector<1x8x32xbf16>
      %140 = vector.shape_cast %139 : vector<1x8x32xbf16> to vector<8x32xbf16>
      %c0_87 = arith.constant 0 : index
      %c0_88 = arith.constant 0 : index
      %141 = vector.load %arg7[%c0_87, %c0_88] : memref<32x32xbf16, #tpu.memory_space<vmem>>, vector<32x32xbf16>
      %cst_89 = arith.constant dense<0.000000e+00> : vector<8x32xf32>
      %142 = tpu.matmul %140, %141, %cst_89 {dimension_numbers = #tpu.dot_dimension_numbers<[1], [0], [0], [1], [0, 0, 1, 1], [], []>} : vector<8x32xbf16>, vector<32x32xbf16>, vector<8x32xf32> -> vector<8x32xf32>
      %143 = arith.truncf %142 : vector<8x32xf32> to vector<8x32xbf16>
      %c0_90 = arith.constant 0 : index
      %c0_91 = arith.constant 0 : index
      %144 = vector.load %arg14[%c0_90, %c0_91] : memref<8x32xbf16, #tpu.memory_space<vmem>>, vector<8x32xbf16>
      tpu.vector_store %arg14[%c0_90, %c0_91], %143 {strides = array<i32>} : memref<8x32xbf16, #tpu.memory_space<vmem>>, vector<8x32xbf16>,
      %c0_92 = arith.constant 0 : index
      %c0_93 = arith.constant 0 : index
      %c0_94 = arith.constant 0 : index
      %145 = vector.load %arg4[%c0_92, %c0_93, %c0_94] : memref<1x8x32xbf16, #tpu.memory_space<vmem>>, vector<1x8x32xbf16>
      %146 = vector.shape_cast %145 : vector<1x8x32xbf16> to vector<8x32xbf16>
      %c0_95 = arith.constant 0 : index
      %c0_96 = arith.constant 0 : index
      %147 = vector.load %arg8[%c0_95, %c0_96] : memref<32x32xbf16, #tpu.memory_space<vmem>>, vector<32x32xbf16>
      %cst_97 = arith.constant dense<0.000000e+00> : vector<8x32xf32>
      %148 = tpu.matmul %146, %147, %cst_97 {dimension_numbers = #tpu.dot_dimension_numbers<[1], [0], [0], [1], [0, 0, 1, 1], [], []>} : vector<8x32xbf16>, vector<32x32xbf16>, vector<8x32xf32> -> vector<8x32xf32>
      %149 = arith.truncf %148 : vector<8x32xf32> to vector<8x32xbf16>
      %c0_98 = arith.constant 0 : index
      %c0_99 = arith.constant 0 : index
      %150 = vector.load %arg15[%c0_98, %c0_99] : memref<8x32xbf16, #tpu.memory_space<vmem>>, vector<8x32xbf16>
      tpu.vector_store %arg15[%c0_98, %c0_99], %149 {strides = array<i32>} : memref<8x32xbf16, #tpu.memory_space<vmem>>, vector<8x32xbf16>,
    } else {
    }
    %c0 = arith.constant 0 : index
    %c0_1 = arith.constant 0 : index
    %c0_2 = arith.constant 0 : index
    %3 = vector.load %arg2[%c0, %c0_1, %c0_2] : memref<1x8x32xf32, #tpu.memory_space<vmem>>, vector<1x8x32xf32>
    %4 = vector.shape_cast %3 : vector<1x8x32xf32> to vector<8x32xf32>
    %c0_3 = arith.constant 0 : index
    %c0_4 = arith.constant 0 : index
    %c0_5 = arith.constant 0 : index
    %5 = vector.load %arg5[%c0_3, %c0_4, %c0_5] : memref<1x8x8xi8, #tpu.memory_space<vmem>>, vector<1x8x8xi8>
    %6 = vector.shape_cast %5 : vector<1x8x8xi8> to vector<8x8xi8>
    %c0_i8 = arith.constant 0 : i8
    %7 = vector.broadcast %c0_i8 : i8 to vector<8x8xi8>
    %8 = arith.cmpi ne, %6, %7 : vector<8x8xi8>
    %9 = arith.truncf %4 : vector<8x32xf32> to vector<8x32xbf16>
    %c0_6 = arith.constant 0 : index
    %c0_7 = arith.constant 0 : index
    %10 = vector.load %arg6[%c0_6, %c0_7] : memref<32x32xbf16, #tpu.memory_space<vmem>>, vector<32x32xbf16>
    %cst = arith.constant dense<0.000000e+00> : vector<8x32xf32>
    %11 = tpu.matmul %9, %10, %cst {dimension_numbers = #tpu.dot_dimension_numbers<[1], [0], [0], [1], [0, 0, 1, 1], [], []>} : vector<8x32xbf16>, vector<32x32xbf16>, vector<8x32xf32> -> vector<8x32xf32>
    %cst_8 = arith.constant 0.353553385 : f32
    %12 = vector.broadcast %cst_8 : f32 to vector<8x32xf32>
    %13 = arith.mulf %11, %12 : vector<8x32xf32>
    %14 = arith.truncf %13 : vector<8x32xf32> to vector<8x32xbf16>
    %c0_9 = arith.constant 0 : index
    %c0_10 = arith.constant 0 : index
    %15 = vector.load %arg16[%c0_9, %c0_10] : memref<8x32xbf16, #tpu.memory_space<vmem>>, vector<8x32xbf16>
    tpu.vector_store %arg16[%c0_9, %c0_10], %14 {strides = array<i32>} : memref<8x32xbf16, #tpu.memory_space<vmem>>, vector<8x32xbf16>,
    %c0_11 = arith.constant 0 : index
    %c0_12 = arith.constant 0 : index
    %16 = vector.load %arg16[%c0_11, %c0_12] : memref<8x32xbf16, #tpu.memory_space<vmem>>, vector<8x8xbf16>
    %c0_13 = arith.constant 0 : index
    %c0_14 = arith.constant 0 : index
    %17 = vector.load %arg14[%c0_13, %c0_14] : memref<8x32xbf16, #tpu.memory_space<vmem>>, vector<8x8xbf16>
    %c0_15 = arith.constant 0 : index
    %c0_16 = arith.constant 0 : index
    %18 = vector.load %arg15[%c0_15, %c0_16] : memref<8x32xbf16, #tpu.memory_space<vmem>>, vector<8x8xbf16>
    %cst_17 = arith.constant dense<0.000000e+00> : vector<8x8xf32>
    %19 = tpu.matmul %16, %17, %cst_17 {dimension_numbers = #tpu.dot_dimension_numbers<[1], [1], [0], [0], [0, 0, 1, 0], [], []>} : vector<8x8xbf16>, vector<8x8xbf16>, vector<8x8xf32> -> vector<8x8xf32>
    %cst_18 = arith.constant -1.000000e+09 : f32
    %20 = vector.broadcast %cst_18 : f32 to vector<8x8xf32>
    %21 = arith.select %8, %20, %19 : vector<8x8xi1>, vector<8x8xf32>
    %cst_19 = arith.constant dense<0xFF800000> : vector<8xf32>
    %22 = vector.multi_reduction <maximumf>, %21, %cst_19 [1] : vector<8x8xf32> to vector<8xf32>
    %23 = vector.shape_cast %22 : vector<8xf32> to vector<8x1xf32>
    %24 = vector.broadcast %23 : vector<8x1xf32> to vector<8x8xf32>
    %25 = arith.subf %21, %24 : vector<8x8xf32>
    %26 = math.exp %25 : vector<8x8xf32>
    %cst_20 = arith.constant dense<0.000000e+00> : vector<8xf32>
    %27 = vector.multi_reduction <add>, %26, %cst_20 [1] : vector<8x8xf32> to vector<8xf32>
    %28 = vector.shape_cast %27 : vector<8xf32> to vector<8x1xf32>
    %29 = tpu.reciprocal %28 {approx = true} : vector<8x1xf32> -> vector<8x1xf32>
    %30 = vector.broadcast %29 : vector<8x1xf32> to vector<8x8xf32>
    %31 = arith.mulf %26, %30 : vector<8x8xf32>
    %32 = arith.truncf %31 : vector<8x8xf32> to vector<8x8xbf16>
    %c0_21 = arith.constant 0 : index
    %c0_22 = arith.constant 0 : index
    %c0_23 = arith.constant 0 : index
    %c0_24 = arith.constant 0 : index
    %33 = vector.load %arg13[%c0_21, %c0_22, %c0_23, %c0_24] : memref<1x4x8x8xbf16, #tpu.memory_space<vmem>>, vector<1x1x8x8xbf16>
    %34 = vector.shape_cast %33 : vector<1x1x8x8xbf16> to vector<8x8xbf16>
    %35 = vector.shape_cast %32 : vector<8x8xbf16> to vector<1x1x8x8xbf16>
    tpu.vector_store %arg13[%c0_21, %c0_22, %c0_23, %c0_24], %35 {strides = array<i32>} : memref<1x4x8x8xbf16, #tpu.memory_space<vmem>>, vector<1x1x8x8xbf16>,
    %36 = arith.truncf %31 : vector<8x8xf32> to vector<8x8xbf16>
    %cst_25 = arith.constant dense<0.000000e+00> : vector<8x8xf32>
    %37 = tpu.matmul %36, %18, %cst_25 {dimension_numbers = #tpu.dot_dimension_numbers<[1], [0], [0], [1], [0, 0, 1, 1], [], []>} : vector<8x8xbf16>, vector<8x8xbf16>, vector<8x8xf32> -> vector<8x8xf32>
    %38 = arith.truncf %37 : vector<8x8xf32> to vector<8x8xbf16>
    %c0_26 = arith.constant 0 : index
    %c8 = arith.constant 8 : index
    %39 = vector.load %arg16[%c0_26, %c8] : memref<8x32xbf16, #tpu.memory_space<vmem>>, vector<8x8xbf16>
    %c0_27 = arith.constant 0 : index
    %c8_28 = arith.constant 8 : index
    %40 = vector.load %arg14[%c0_27, %c8_28] : memref<8x32xbf16, #tpu.memory_space<vmem>>, vector<8x8xbf16>
    %c0_29 = arith.constant 0 : index
    %c8_30 = arith.constant 8 : index
    %41 = vector.load %arg15[%c0_29, %c8_30] : memref<8x32xbf16, #tpu.memory_space<vmem>>, vector<8x8xbf16>
    %cst_31 = arith.constant dense<0.000000e+00> : vector<8x8xf32>
    %42 = tpu.matmul %39, %40, %cst_31 {dimension_numbers = #tpu.dot_dimension_numbers<[1], [1], [0], [0], [0, 0, 1, 0], [], []>} : vector<8x8xbf16>, vector<8x8xbf16>, vector<8x8xf32> -> vector<8x8xf32>
    %cst_32 = arith.constant -1.000000e+09 : f32
    %43 = vector.broadcast %cst_32 : f32 to vector<8x8xf32>
    %44 = arith.select %8, %43, %42 : vector<8x8xi1>, vector<8x8xf32>
    %cst_33 = arith.constant dense<0xFF800000> : vector<8xf32>
    %45 = vector.multi_reduction <maximumf>, %44, %cst_33 [1] : vector<8x8xf32> to vector<8xf32>
    %46 = vector.shape_cast %45 : vector<8xf32> to vector<8x1xf32>
    %47 = vector.broadcast %46 : vector<8x1xf32> to vector<8x8xf32>
    %48 = arith.subf %44, %47 : vector<8x8xf32>
    %49 = math.exp %48 : vector<8x8xf32>
    %cst_34 = arith.constant dense<0.000000e+00> : vector<8xf32>
    %50 = vector.multi_reduction <add>, %49, %cst_34 [1] : vector<8x8xf32> to vector<8xf32>
    %51 = vector.shape_cast %50 : vector<8xf32> to vector<8x1xf32>
    %52 = tpu.reciprocal %51 {approx = true} : vector<8x1xf32> -> vector<8x1xf32>
    %53 = vector.broadcast %52 : vector<8x1xf32> to vector<8x8xf32>
    %54 = arith.mulf %49, %53 : vector<8x8xf32>
    %55 = arith.truncf %54 : vector<8x8xf32> to vector<8x8xbf16>
    %c0_35 = arith.constant 0 : index
    %c1 = arith.constant 1 : index
    %c0_36 = arith.constant 0 : index
    %c0_37 = arith.constant 0 : index
    %56 = vector.load %arg13[%c0_35, %c1, %c0_36, %c0_37] : memref<1x4x8x8xbf16, #tpu.memory_space<vmem>>, vector<1x1x8x8xbf16>
    %57 = vector.shape_cast %56 : vector<1x1x8x8xbf16> to vector<8x8xbf16>
    %58 = vector.shape_cast %55 : vector<8x8xbf16> to vector<1x1x8x8xbf16>
    tpu.vector_store %arg13[%c0_35, %c1, %c0_36, %c0_37], %58 {strides = array<i32>} : memref<1x4x8x8xbf16, #tpu.memory_space<vmem>>, vector<1x1x8x8xbf16>,
    %59 = arith.truncf %54 : vector<8x8xf32> to vector<8x8xbf16>
    %cst_38 = arith.constant dense<0.000000e+00> : vector<8x8xf32>
    %60 = tpu.matmul %59, %41, %cst_38 {dimension_numbers = #tpu.dot_dimension_numbers<[1], [0], [0], [1], [0, 0, 1, 1], [], []>} : vector<8x8xbf16>, vector<8x8xbf16>, vector<8x8xf32> -> vector<8x8xf32>
    %61 = arith.truncf %60 : vector<8x8xf32> to vector<8x8xbf16>
    %c0_39 = arith.constant 0 : index
    %c16 = arith.constant 16 : index
    %62 = vector.load %arg16[%c0_39, %c16] : memref<8x32xbf16, #tpu.memory_space<vmem>>, vector<8x8xbf16>
    %c0_40 = arith.constant 0 : index
    %c16_41 = arith.constant 16 : index
    %63 = vector.load %arg14[%c0_40, %c16_41] : memref<8x32xbf16, #tpu.memory_space<vmem>>, vector<8x8xbf16>
    %c0_42 = arith.constant 0 : index
    %c16_43 = arith.constant 16 : index
    %64 = vector.load %arg15[%c0_42, %c16_43] : memref<8x32xbf16, #tpu.memory_space<vmem>>, vector<8x8xbf16>
    %cst_44 = arith.constant dense<0.000000e+00> : vector<8x8xf32>
    %65 = tpu.matmul %62, %63, %cst_44 {dimension_numbers = #tpu.dot_dimension_numbers<[1], [1], [0], [0], [0, 0, 1, 0], [], []>} : vector<8x8xbf16>, vector<8x8xbf16>, vector<8x8xf32> -> vector<8x8xf32>
    %cst_45 = arith.constant -1.000000e+09 : f32
    %66 = vector.broadcast %cst_45 : f32 to vector<8x8xf32>
    %67 = arith.select %8, %66, %65 : vector<8x8xi1>, vector<8x8xf32>
    %cst_46 = arith.constant dense<0xFF800000> : vector<8xf32>
    %68 = vector.multi_reduction <maximumf>, %67, %cst_46 [1] : vector<8x8xf32> to vector<8xf32>
    %69 = vector.shape_cast %68 : vector<8xf32> to vector<8x1xf32>
    %70 = vector.broadcast %69 : vector<8x1xf32> to vector<8x8xf32>
    %71 = arith.subf %67, %70 : vector<8x8xf32>
    %72 = math.exp %71 : vector<8x8xf32>
    %cst_47 = arith.constant dense<0.000000e+00> : vector<8xf32>
    %73 = vector.multi_reduction <add>, %72, %cst_47 [1] : vector<8x8xf32> to vector<8xf32>
    %74 = vector.shape_cast %73 : vector<8xf32> to vector<8x1xf32>
    %75 = tpu.reciprocal %74 {approx = true} : vector<8x1xf32> -> vector<8x1xf32>
    %76 = vector.broadcast %75 : vector<8x1xf32> to vector<8x8xf32>
    %77 = arith.mulf %72, %76 : vector<8x8xf32>
    %78 = arith.truncf %77 : vector<8x8xf32> to vector<8x8xbf16>
    %c0_48 = arith.constant 0 : index
    %c2 = arith.constant 2 : index
    %c0_49 = arith.constant 0 : index
    %c0_50 = arith.constant 0 : index
    %79 = vector.load %arg13[%c0_48, %c2, %c0_49, %c0_50] : memref<1x4x8x8xbf16, #tpu.memory_space<vmem>>, vector<1x1x8x8xbf16>
    %80 = vector.shape_cast %79 : vector<1x1x8x8xbf16> to vector<8x8xbf16>
    %81 = vector.shape_cast %78 : vector<8x8xbf16> to vector<1x1x8x8xbf16>
    tpu.vector_store %arg13[%c0_48, %c2, %c0_49, %c0_50], %81 {strides = array<i32>} : memref<1x4x8x8xbf16, #tpu.memory_space<vmem>>, vector<1x1x8x8xbf16>,
    %82 = arith.truncf %77 : vector<8x8xf32> to vector<8x8xbf16>
    %cst_51 = arith.constant dense<0.000000e+00> : vector<8x8xf32>
    %83 = tpu.matmul %82, %64, %cst_51 {dimension_numbers = #tpu.dot_dimension_numbers<[1], [0], [0], [1], [0, 0, 1, 1], [], []>} : vector<8x8xbf16>, vector<8x8xbf16>, vector<8x8xf32> -> vector<8x8xf32>
    %84 = arith.truncf %83 : vector<8x8xf32> to vector<8x8xbf16>
    %c0_52 = arith.constant 0 : index
    %c24 = arith.constant 24 : index
    %85 = vector.load %arg16[%c0_52, %c24] : memref<8x32xbf16, #tpu.memory_space<vmem>>, vector<8x8xbf16>
    %c0_53 = arith.constant 0 : index
    %c24_54 = arith.constant 24 : index
    %86 = vector.load %arg14[%c0_53, %c24_54] : memref<8x32xbf16, #tpu.memory_space<vmem>>, vector<8x8xbf16>
    %c0_55 = arith.constant 0 : index
    %c24_56 = arith.constant 24 : index
    %87 = vector.load %arg15[%c0_55, %c24_56] : memref<8x32xbf16, #tpu.memory_space<vmem>>, vector<8x8xbf16>
    %cst_57 = arith.constant dense<0.000000e+00> : vector<8x8xf32>
    %88 = tpu.matmul %85, %86, %cst_57 {dimension_numbers = #tpu.dot_dimension_numbers<[1], [1], [0], [0], [0, 0, 1, 0], [], []>} : vector<8x8xbf16>, vector<8x8xbf16>, vector<8x8xf32> -> vector<8x8xf32>
    %cst_58 = arith.constant -1.000000e+09 : f32
    %89 = vector.broadcast %cst_58 : f32 to vector<8x8xf32>
    %90 = arith.select %8, %89, %88 : vector<8x8xi1>, vector<8x8xf32>
    %cst_59 = arith.constant dense<0xFF800000> : vector<8xf32>
    %91 = vector.multi_reduction <maximumf>, %90, %cst_59 [1] : vector<8x8xf32> to vector<8xf32>
    %92 = vector.shape_cast %91 : vector<8xf32> to vector<8x1xf32>
    %93 = vector.broadcast %92 : vector<8x1xf32> to vector<8x8xf32>
    %94 = arith.subf %90, %93 : vector<8x8xf32>
    %95 = math.exp %94 : vector<8x8xf32>
    %cst_60 = arith.constant dense<0.000000e+00> : vector<8xf32>
    %96 = vector.multi_reduction <add>, %95, %cst_60 [1] : vector<8x8xf32> to vector<8xf32>
    %97 = vector.shape_cast %96 : vector<8xf32> to vector<8x1xf32>
    %98 = tpu.reciprocal %97 {approx = true} : vector<8x1xf32> -> vector<8x1xf32>
    %99 = vector.broadcast %98 : vector<8x1xf32> to vector<8x8xf32>
    %100 = arith.mulf %95, %99 : vector<8x8xf32>
    %101 = arith.truncf %100 : vector<8x8xf32> to vector<8x8xbf16>
    %c0_61 = arith.constant 0 : index
    %c3 = arith.constant 3 : index
    %c0_62 = arith.constant 0 : index
    %c0_63 = arith.constant 0 : index
    %102 = vector.load %arg13[%c0_61, %c3, %c0_62, %c0_63] : memref<1x4x8x8xbf16, #tpu.memory_space<vmem>>, vector<1x1x8x8xbf16>
    %103 = vector.shape_cast %102 : vector<1x1x8x8xbf16> to vector<8x8xbf16>
    %104 = vector.shape_cast %101 : vector<8x8xbf16> to vector<1x1x8x8xbf16>
    tpu.vector_store %arg13[%c0_61, %c3, %c0_62, %c0_63], %104 {strides = array<i32>} : memref<1x4x8x8xbf16, #tpu.memory_space<vmem>>, vector<1x1x8x8xbf16>,
    %105 = arith.truncf %100 : vector<8x8xf32> to vector<8x8xbf16>
    %cst_64 = arith.constant dense<0.000000e+00> : vector<8x8xf32>
    %106 = tpu.matmul %105, %87, %cst_64 {dimension_numbers = #tpu.dot_dimension_numbers<[1], [0], [0], [1], [0, 0, 1, 1], [], []>} : vector<8x8xbf16>, vector<8x8xbf16>, vector<8x8xf32> -> vector<8x8xf32>
    %107 = arith.truncf %106 : vector<8x8xf32> to vector<8x8xbf16>
    %108 = tpu.concatenate %38, %61, %84, %107 in 1 : vector<8x8xbf16>, vector<8x8xbf16>, vector<8x8xbf16>, vector<8x8xbf16> -> vector<8x32xbf16>
    %c0_65 = arith.constant 0 : index
    %c0_66 = arith.constant 0 : index
    %109 = vector.load %arg17[%c0_65, %c0_66] : memref<8x32xbf16, #tpu.memory_space<vmem>>, vector<8x32xbf16>
    tpu.vector_store %arg17[%c0_65, %c0_66], %108 {strides = array<i32>} : memref<8x32xbf16, #tpu.memory_space<vmem>>, vector<8x32xbf16>,
    %c0_67 = arith.constant 0 : index
    %c0_68 = arith.constant 0 : index
    %110 = vector.load %arg17[%c0_67, %c0_68] : memref<8x32xbf16, #tpu.memory_space<vmem>>, vector<8x32xbf16>
    %c0_69 = arith.constant 0 : index
    %c0_70 = arith.constant 0 : index
    %111 = vector.load %arg9[%c0_69, %c0_70] : memref<32x32xbf16, #tpu.memory_space<vmem>>, vector<32x32xbf16>
    %cst_71 = arith.constant dense<0.000000e+00> : vector<8x32xf32>
    %112 = tpu.matmul %110, %111, %cst_71 {dimension_numbers = #tpu.dot_dimension_numbers<[1], [0], [0], [1], [0, 0, 1, 1], [], []>} : vector<8x32xbf16>, vector<32x32xbf16>, vector<8x32xf32> -> vector<8x32xf32>
    %113 = arith.addf %4, %112 : vector<8x32xf32>
    %cst_72 = arith.constant dense<0.000000e+00> : vector<8xf32>
    %114 = vector.multi_reduction <add>, %113, %cst_72 [1] : vector<8x32xf32> to vector<8xf32>
    %115 = vector.shape_cast %114 : vector<8xf32> to vector<8x1xf32>
    %cst_73 = arith.constant 3.200000e+01 : f32
    %116 = vector.broadcast %cst_73 : f32 to vector<8x1xf32>
    %117 = arith.divf %115, %116 : vector<8x1xf32>
    %118 = vector.broadcast %117 : vector<8x1xf32> to vector<8x32xf32>
    %119 = arith.subf %113, %118 : vector<8x32xf32>
    %120 = arith.mulf %119, %119 : vector<8x32xf32>
    %cst_74 = arith.constant dense<0.000000e+00> : vector<8xf32>
    %121 = vector.multi_reduction <add>, %120, %cst_74 [1] : vector<8x32xf32> to vector<8xf32>
    %122 = vector.shape_cast %121 : vector<8xf32> to vector<8x1xf32>
    %cst_75 = arith.constant 3.200000e+01 : f32
    %123 = vector.broadcast %cst_75 : f32 to vector<8x1xf32>
    %124 = arith.divf %122, %123 : vector<8x1xf32>
    %cst_76 = arith.constant 9.99999974E-6 : f32
    %125 = vector.broadcast %cst_76 : f32 to vector<8x1xf32>
    %126 = arith.addf %124, %125 : vector<8x1xf32>
    %127 = math.rsqrt %126 : vector<8x1xf32>
    %128 = vector.broadcast %127 : vector<8x1xf32> to vector<8x32xf32>
    %129 = arith.mulf %119, %128 : vector<8x32xf32>
    %c0_77 = arith.constant 0 : index
    %c0_78 = arith.constant 0 : index
    %130 = vector.load %arg10[%c0_77, %c0_78] : memref<1x32xf32, #tpu.memory_space<vmem>>, vector<1x32xf32>
    %131 = vector.broadcast %130 : vector<1x32xf32> to vector<8x32xf32>
    %132 = arith.mulf %129, %131 : vector<8x32xf32>
    %c0_79 = arith.constant 0 : index
    %c0_80 = arith.constant 0 : index
    %133 = vector.load %arg11[%c0_79, %c0_80] : memref<1x32xf32, #tpu.memory_space<vmem>>, vector<1x32xf32>
    %134 = vector.broadcast %133 : vector<1x32xf32> to vector<8x32xf32>
    %135 = arith.addf %132, %134 : vector<8x32xf32>
    %c0_81 = arith.constant 0 : index
    %c0_82 = arith.constant 0 : index
    %c0_83 = arith.constant 0 : index
    %136 = vector.load %arg12[%c0_81, %c0_82, %c0_83] : memref<1x8x32xf32, #tpu.memory_space<vmem>>, vector<1x8x32xf32>
    %137 = vector.shape_cast %136 : vector<1x8x32xf32> to vector<8x32xf32>
    %138 = vector.shape_cast %135 : vector<8x32xf32> to vector<1x8x32xf32>
    tpu.vector_store %arg12[%c0_81, %c0_82, %c0_83], %138 {strides = array<i32>} : memref<1x8x32xf32, #tpu.memory_space<vmem>>, vector<1x8x32xf32>,
    return
  }
  func.func @transform_0(%arg0: i32, %arg1: i32) -> (i32, i32, i32) {
    %c0_i32 = arith.constant 0 : i32
    %c0_i32_0 = arith.constant 0 : i32
    return %arg0, %arg1, %c0_i32 : i32, i32, i32
  }
  func.func @transform_1(%arg0: i32, %arg1: i32) -> (i32, i32, i32) {
    %c0_i32 = arith.constant 0 : i32
    %c0_i32_0 = arith.constant 0 : i32
    %c0_i32_1 = arith.constant 0 : i32
    return %arg0, %c0_i32, %c0_i32_0 : i32, i32, i32
  }
  func.func @transform_2(%arg0: i32, %arg1: i32) -> (i32, i32, i32) {
    %c0_i32 = arith.constant 0 : i32
    %c0_i32_0 = arith.constant 0 : i32
    %c0_i32_1 = arith.constant 0 : i32
    return %arg0, %c0_i32, %c0_i32_0 : i32, i32, i32
  }
  func.func @transform_3(%arg0: i32, %arg1: i32) -> (i32, i32, i32) {
    %c0_i32 = arith.constant 0 : i32
    %c0_i32_0 = arith.constant 0 : i32
    return %arg0, %arg1, %c0_i32 : i32, i32, i32
  }
  func.func @transform_4(%arg0: i32, %arg1: i32) -> (i32, i32) {
    %c0_i32 = arith.constant 0 : i32
    %c0_i32_0 = arith.constant 0 : i32
    %c0_i32_1 = arith.constant 0 : i32
    return %c0_i32, %c0_i32_0 : i32, i32
  }
  func.func @transform_5(%arg0: i32, %arg1: i32) -> (i32, i32) {
    %c0_i32 = arith.constant 0 : i32
    %c0_i32_0 = arith.constant 0 : i32
    %c0_i32_1 = arith.constant 0 : i32
    return %c0_i32, %c0_i32_0 : i32, i32
  }
  func.func @transform_6(%arg0: i32, %arg1: i32) -> (i32, i32) {
    %c0_i32 = arith.constant 0 : i32
    %c0_i32_0 = arith.constant 0 : i32
    %c0_i32_1 = arith.constant 0 : i32
    return %c0_i32, %c0_i32_0 : i32, i32
  }
  func.func @transform_7(%arg0: i32, %arg1: i32) -> (i32, i32) {
    %c0_i32 = arith.constant 0 : i32
    %c0_i32_0 = arith.constant 0 : i32
    %c0_i32_1 = arith.constant 0 : i32
    return %c0_i32, %c0_i32_0 : i32, i32
  }
  func.func @transform_8(%arg0: i32, %arg1: i32) -> (i32, i32) {
    %c0_i32 = arith.constant 0 : i32
    %c0_i32_0 = arith.constant 0 : i32
    %c0_i32_1 = arith.constant 0 : i32
    return %c0_i32, %c0_i32_0 : i32, i32
  }
  func.func @transform_9(%arg0: i32, %arg1: i32) -> (i32, i32) {
    %c0_i32 = arith.constant 0 : i32
    %c0_i32_0 = arith.constant 0 : i32
    %c0_i32_1 = arith.constant 0 : i32
    return %c0_i32, %c0_i32_0 : i32, i32
  }
  func.func @transform_10(%arg0: i32, %arg1: i32) -> (i32, i32, i32) {
    %c0_i32 = arith.constant 0 : i32
    %c0_i32_0 = arith.constant 0 : i32
    return %arg0, %arg1, %c0_i32 : i32, i32, i32
  }
  func.func @transform_11(%arg0: i32, %arg1: i32) -> (i32, i32, i32, i32) {
    %c0_i32 = arith.constant 0 : i32
    %c0_i32_0 = arith.constant 0 : i32
    %c0_i32_1 = arith.constant 0 : i32
    return %arg0, %c0_i32, %arg1, %c0_i32_0 : i32, i32, i32, i32
  }
}

</mosaic_0001>

<bundles_post_ra>
// kernel: tpu_custom_call.1
= control target key start
LH: loop header
LB: loop body
LE: loop exit
PB: predicated region body
PF: predicated region fallthrough
CT: control target
= control target key end

     0   :  { %s2366_s0 = inlined_call_operand.hbm [shape: f32[2,8,32], index: 0, kind: input, shape index: {}]   ;;  %s2367_s1 = inlined_call_operand.hbm [shape: bf16[2,8,32], index: 1, kind: input, shape index: {}]   ;;  %s2368_s2 = inlined_call_operand.hbm [shape: bf16[2,8,32], index: 2, kind: input, shape index: {}]   ;;  %s2369_s3 = inlined_call_operand.hbm [shape: s8[2,8,8], index: 3, kind: input, shape index: {}]   ;;  %s2370_s4 = inlined_call_operand.hbm [shape: bf16[32,32], index: 4, kind: input, shape index: {}]   ;;  %s2371_s5 = inlined_call_operand.hbm [shape: bf16[32,32], index: 5, kind: input, shape index: {}]   ;;  %s2372_s6 = inlined_call_operand.hbm [shape: bf16[32,32], index: 6, kind: input, shape index: {}]   ;;  %s2373_s7 = inlined_call_operand.hbm [shape: bf16[32,32], index: 7, kind: input, shape index: {}]   ;;  %s2374_s8 = inlined_call_operand.vmem [shape: f32[1,32], index: 8, kind: input, shape index: {}]   ;;  %s2375_s9 = inlined_call_operand.vmem [shape: f32[1,32], index: 9, kind: input, shape index: {}]   ;;  %s2376_s10 = inlined_call_operand.hbm [shape: f32[2,8,32], index: 10, kind: output, shape index: {0}]   ;;  %s2377_s11 = inlined_call_operand.hbm [shape: bf16[2,4,8,8], index: 11, kind: output, shape index: {1}]  }
   0x1   :  { %2385 = sst [smem:[#allocation34_spill]] %s2367_s1 }
   0x2   :  { %2386 = sst [smem:[#allocation35_spill]] %s2368_s2 }
   0x3   :  { %2387 = sst [smem:[#allocation36_spill]] %s2370_s4 }
   0x4   :  { %2388 = sst [smem:[#allocation37_spill]] %s2371_s5 }
   0x5   :  { %2389 = sst [smem:[#allocation38_spill]] %s2372_s6 }
   0x6   :  { %2390 = sst [smem:[#allocation39_spill]] %s2373_s7 }
   0x7   :  { %2391 = sst [smem:[#allocation40_spill]] %s2374_s8 }
   0x8   :  { %2392 = sst [smem:[#allocation41_spill]] %s2375_s9 }
   0x9   :  { %2393 = sst [smem:[#allocation42_spill]] %s2376_s10 }
   0xa   :  { %2394 = sst [smem:[#allocation43_spill]] %s2377_s11 }
   0xb   :  { %17 = vsyncpa [#allocation7], 0 }
   0xc   :  { %19 = vsyncpa [#allocation7 + $0x1], 0 }
   0xd   :  { %20 = vsyncpa [#allocation10], 0 }
   0xe   :  { %21 = vsyncpa [#allocation13], 0 }
   0xf   :  { %23 = vsyncpa [#allocation13 + $0x1], 0 }
  0x10   :  { %24 = vsyncpa [#allocation16], 0 }
  0x11   :  { %25 = vsyncpa [#allocation19], 0 }
  0x12   :  { %26 = vsyncpa [#allocation8], 0 }
  0x13   :  { %28 = vsyncpa [#allocation8 + $0x1], 0 }
  0x14   :  { %29 = vsyncpa [#allocation22], 0 }
  0x15   :  { %31 = vsyncpa [#allocation22 + $0x1], 0  ;;  %s2022_s17 = smov 0   ;;  %s2024_s18 = smov 0  }
  0x16   :  { %s2026_s19 = smov 0   ;;  %s2028_s20 = smov 0  }
  0x17   :  { %s2030_s21 = smov 0   ;;  %s2032_s22 = smov 0  }
  0x18 LB: > { %2395 = sst [smem:[#allocation31_spill]] %s1922_s17  ;;  %s2053_s23 = sadd.s32 4294967295, %s1942_s22   ;;  %s1942_s22 = sphi %s2032_s22, %s37_s22   ;;  %s1938_s21 = sphi %s2030_s21, %s2432_s21   ;;  %s1934_s20 = sphi %s2028_s20, %s2431_s20   ;;  %s1930_s19 = sphi %s2026_s19, %s2430_s19   ;;  %s1926_s18 = sphi %s2024_s18, %s2429_s18   ;;  %s1922_s17 = sphi %s2022_s17, %s2428_s17  }
  0x19   : > { %s1324_s24 = sadd.s32 4294967294, %s1942_s22   ;;  %p71_p0 = scmp.ne.s32.totalorder %s1926_s18, %s1922_s17 }
  0x1a   : > { %p2382_p1 = scmp.eq.s32.totalorder %s2053_s23, 0  ;;  %p303_p2 = scmp.eq.s32.totalorder %s2053_s23, 1 }
  0x1b   : > { %p309_p3 = scmp.eq.s32.totalorder %s1324_s24, 1  ;;  %p1325_p5 = scmp.ge.s32.totalorder %s1942_s22, 1 }
  0x1c   : > { %p2062_p4 = por %p2382_p1, %p71_p0  ;;  %p344_p7 = scmp.lt.s32.totalorder %s1942_s22, 3 }
  0x1d   : > { %p2067_p6 = por %p309_p3, %p71_p0  ;;  %s2378_s27 = sshll.u32 %s1934_s20, 2 }
  0x1e   : > { %p2073_p8 = pnand %p1325_p5, %p344_p7  ;;  %s2400_s1 = sld [smem:[#allocation34_spill]] }
  0x1f   : > { %s2397_s26 = scalar_select %p2067_p6, 1, 0 }
  0x20   : > { %s1944_s14 = smov [#allocation9]   ;;  %p1437_p9 = pneg %p2073_p8 }
  0x21   : > { %2398 = sst [smem:[#allocation32_spill]] %s2397_s26  ;;  %s360_s15 = sshll.u32 %s1944_s14, 4  ;;  %s361_s15 = int_to_ptr.vmem [resolvable:$true] %s360_s15 }
  0x22   : > { %p2086_p10 = pnand %p1437_p9, %p2062_p4  ;;  %p2092_p11 = pnand %p1437_p9, %p2382_p1 }
  0x23   : > { %s2403_s4 = sld [smem:[#allocation36_spill]] }
  0x24   : > { %s356_s12 = scalar_lea.hbm %s2400_s1, %s2378_s27  ;;  %p1572_p0 = pneg %p2086_p10 }
  0x25   : > { %s358_s13 = sshll.u32 %s356_s12, 4  ;;  %s1575_s9 = scalar_lea.hbm %s2400_s1, 8  ;;  %s359_s13 = int_to_ptr.hbm [resolvable:$true] %s358_s13 }
  0x26   : > { %s1568_s14 = sshra.s32 %s359_s13, 4  ;;  %s1569_s14 = int_to_ptr.hbm [resolvable:$true] %s1568_s14 }
  0x27   : > { %s1570_s27 = scalar_lea.hbm %s1569_s14, 4  ;;  %p1576_p7 = scmp.lt.s32.totalorder %s1569_s14, %s2400_s1 }
  0x28   : > { %p1571_p13 = scmp.ne.s32.totalorder %s1569_s14, %s1570_s27  ;;  %p1577_p9 = scmp.lt.s32.totalorder %s1575_s9, %s1570_s27 }
  0x29   : > { %s383_s12 = sshll.u32 %s2403_s4, 4  ;;  %s384_s12 = int_to_ptr.hbm [resolvable:$true] %s383_s12 }
  0x2a   : > { %p1573_p3 = pnand %p1572_p0, %p1571_p13  ;;  %p1578_p12 = por %p1577_p9, %p1576_p7 }
  0x2c   : > { %p1574_p5 = pneg %p1573_p3 }
  0x2e   : > { %p1579_p1 = pnand %p1578_p12, %p1574_p5 }
  0x30   : > { %1582 = shalt.err (!%p1579_p1)
}
  0x31   : > { %1440 = dma.hbm_to_vmem [thread:$0]  (!%p2086_p10), %s359_s13, 64, %s361_s15, [#allocation10]  }
  0x32   : > { %s1945_s29 = smov [#allocation14]   ;;  %s1946_s17 = smov 64  }
  0x33   : > { %s385_s30 = sshll.u32 %s1945_s29, 4  ;;  %s1947_s26 = smov 4   ;;  %s386_s30 = int_to_ptr.vmem [resolvable:$true] %s385_s30 }
  0x34   : > { %1446 = dma.hbm_to_vmem [thread:$0]  (!%p2092_p11), %s384_s12, 256, %s386_s30, [#allocation13], %s1946_s17, %s1946_s17, %s1947_s26  }
  0x35   : > { %s2404_s5 = sld [smem:[#allocation37_spill]]  ;;  %s1948_s27 = smov [#allocation15]  }
  0x36   : > { %s399_s14 = sshll.u32 %s1948_s27, 4  ;;  %s2405_s13 = sshll.u32 %s1934_s20, 2  ;;  %s400_s14 = int_to_ptr.vmem [resolvable:$true] %s399_s14 }
  0x37   : > { %s2406_s2 = sld [smem:[#allocation35_spill]]  ;;  %s1949_s30 = smov [#allocation11]  }
  0x38   : > { %s374_s8 = sshll.u32 %s1949_s30, 4  ;;  %s2407_s6 = sld [smem:[#allocation38_spill]]  ;;  %s375_s8 = int_to_ptr.vmem [resolvable:$true] %s374_s8 }
  0x3b   : > { %s397_s10 = sshll.u32 %s2404_s5, 4  ;;  %s398_s10 = int_to_ptr.hbm [resolvable:$true] %s397_s10 }
  0x3c   : > { %1449 = dma.hbm_to_vmem [thread:$0]  (!%p2092_p11), %s398_s10, 256, %s400_s14, [#allocation16], %s1946_s17, %s1946_s17, %s1947_s26  }
  0x3d   : > { %s370_s1 = scalar_lea.hbm %s2406_s2, %s2405_s13 }
  0x3e   : > { %s372_s12 = sshll.u32 %s370_s1, 4  ;;  %s411_s27 = sshll.u32 %s2407_s6, 4  ;;  %s373_s12 = int_to_ptr.hbm [resolvable:$true] %s372_s12  ;;  %s412_s27 = int_to_ptr.hbm [resolvable:$true] %s411_s27 }
  0x3f   : > { %s1658_s5 = sshra.s32 %s373_s12, 4  ;;  %s1665_s1 = scalar_lea.hbm %s2406_s2, 8  ;;  %s1659_s5 = int_to_ptr.hbm [resolvable:$true] %s1658_s5 }
  0x40   : > { %s1660_s11 = scalar_lea.hbm %s1659_s5, 4  ;;  %p1666_p3 = scmp.lt.s32.totalorder %s1659_s5, %s2406_s2 }
  0x41   : > { %p1661_p1 = scmp.ne.s32.totalorder %s1659_s5, %s1660_s11  ;;  %p1667_p5 = scmp.lt.s32.totalorder %s1665_s1, %s1660_s11 }
  0x43   : > { %p1663_p12 = pnand %p1661_p1, %p1572_p0  ;;  %p1668_p7 = por %p1667_p5, %p1666_p3 }
  0x45   : > { %p1664_p13 = pneg %p1663_p12 }
  0x47   : > { %p1669_p9 = pnand %p1668_p7, %p1664_p13 }
  0x49   : > { %1672 = shalt.err (!%p1669_p9)
}
  0x4a   : > { %1443 = dma.hbm_to_vmem [thread:$0]  (!%p2086_p10), %s373_s12, 64, %s375_s8, [#allocation10]  }
  0x4b   : > { %s1950_s4 = smov [#allocation17]   ;;  %s2408_s7 = sld [smem:[#allocation39_spill]] }
  0x4c   : > { %s413_s29 = sshll.u32 %s1950_s4, 4  ;;  %s1951_s11 = smov [#allocation18]   ;;  %s414_s29 = int_to_ptr.vmem [resolvable:$true] %s413_s29 }
  0x4d   : > { %1452 = dma.hbm_to_vmem [thread:$0]  (!%p2092_p11), %s412_s27, 256, %s414_s29, [#allocation16], %s1946_s17, %s1946_s17, %s1947_s26  }
  0x4e   : > { %s427_s16 = sshll.u32 %s1951_s11, 4  ;;  %s49_s12 = sadd.s32 1, %s1938_s21  ;;  %s428_s16 = int_to_ptr.vmem [resolvable:$true] %s427_s16 }
  0x4f   : > { %p51_p10 = scmp.ge.s32.totalorder %s49_s12, 2  ;;  %s58_s8 = sadd.s32 1, %s1930_s19 }
  0x50   : > { %p65_p0 = scmp.ne.s32.totalorder %s1930_s19, %s1926_s18  ;;  %p66_p1 = scmp.eq.s32.totalorder %s1942_s22, 0 }
  0x51   : > { %s425_s5 = sshll.u32 %s2408_s7, 4  ;;  %s2434_s12 = smov (%p51_p10, %s49_s12), 0  ;;  %s426_s5 = int_to_ptr.hbm [resolvable:$true] %s425_s5 }
  0x52   : > { %1455 = dma.hbm_to_vmem [thread:$0]  (!%p2092_p11), %s426_s5, 256, %s428_s16, [#allocation19], %s1946_s17, %s1946_s17, %s1947_s26  }
  0x53   : > { %2409 = sst [smem:[#allocation33_spill]] %s2434_s12  ;;  %p2165_p12 = por %p66_p1, %p65_p0 }
  0x54   : > { %p2171_p13 = por %p303_p2, %p65_p0  ;;  %s53_s17 = ssub.s32 %s1938_s21, %s2434_s12 }
  0x55   : > { %p1474_p11 = scmp.lt.s32.totalorder %s1942_s22, 2  ;;  %p56_p3 = scmp.eq.s32.totalorder %s53_s17, 0 }
  0x56   : > { %s447_s26 = sand.u32 1, %s1930_s19   ;;  %s1334_s1 = sshll.u32 %s1938_s21, 3 }
  0x57   : > { %s1333_s13 = sshll.u32 %s447_s26, 3  ;;  %s456_s4 = scalar_lea.hbm %s2366_s0, %s1334_s1 }
  0x58   : > { %s2180_s15 = scalar_select %p56_p3, %s1930_s19, %s58_s8  }
  0x59   : > { %s451_s29 = scalar_lea.vmem [#allocation6], %s1333_s13  ;;  %s458_s9 = sshll.u32 %s456_s4, 4  ;;  %s459_s9 = int_to_ptr.hbm [resolvable:$true] %s458_s9 }
  0x5a   : > { %s460_s30 = sshll.u32 %s451_s29, 4  ;;  %p1457_p2 = pnand %p1474_p11, %p2165_p12  ;;  %s461_s30 = int_to_ptr.vmem [resolvable:$true] %s460_s30 }
  0x5b   : > { %s467_s5 = sand.u32 1, %s1942_s22   ;;  %s1335_s11 = sshll.u32 %s447_s26, 1 }
  0x5c   : > { %s448_s16 = scalar_lea.sflag [#allocation7], %s447_s26  ;;  %s1336_s17 = sshll.u32 %s1938_s21, 1 }
  0x5d   : > { %1459 = dma.hbm_to_vmem [thread:$0]  (!%p1457_p2), %s459_s9, 128, %s461_s30, %s448_s16  }
  0x5e   : > { %s476_s6 = scalar_lea.hbm %s2369_s3, %s1336_s17  ;;  %s471_s7 = scalar_lea.vmem [#allocation12], %s1335_s11 }
  0x5f   : > { %s480_s12 = sshll.u32 %s471_s7, 4  ;;  %s478_s10 = sshll.u32 %s476_s6, 4  ;;  %s481_s12 = int_to_ptr.vmem [resolvable:$true] %s480_s12  ;;  %s479_s10 = int_to_ptr.hbm [resolvable:$true] %s478_s10 }
  0x60   : > { %s468_s13 = scalar_lea.sflag [#allocation13], %s467_s5  ;;  %489 = sbr.rel (%p2073_p8) target bundleno = 1476 (0x5c4), region = 60 }
  0x61   : > { %1462 = dma.hbm_to_vmem [thread:$0]  (!%p1457_p2), %s479_s10, 32, %s481_s12, %s468_s13  }
  0x62   : > { %s2196_s27 = sand.u32 (!%p2073_p8), 1, %s1926_s18  }
  0x63   : > { %s1338_s26 = sshll.u32 (!%p2073_p8), %s2196_s27, 3  ;;  %s492_s2 = scalar_lea.sflag (!%p2073_p8), [#allocation7], %s2196_s27 }
  0x64   : > { %s495_s1 = scalar_lea.vmem (!%p2073_p8), [#allocation6], %s1338_s26 }
  0x65   : > { %1889 = dma.done.wait (%p2062_p4), %s492_s2, 128  }
  0x66   : > { %1891 = vsyncadd (%p2062_p4), %s492_s2, 4294967168 }
  0x67   : > { %1893 = dma.done.wait (%p2062_p4), [#allocation10], 128  }
  0x68   : > { %1895 = vsyncadd (%p2062_p4), [#allocation10], 4294967168  ;;  %s511_s6 = sand.u32 1, %s2053_s23   ;;  %s1339_s7 = sshll.u32 %s2196_s27, 1 }
  0x69   : > { %s512_s28 = scalar_lea.sflag [#allocation13], %s511_s6  ;;  %s2212_s12 = scalar_lea.vmem [#allocation12], %s1339_s7 }
  0x6a   : > { %1897 = dma.done.wait (%p2062_p4), %s512_s28, 32  }
  0x6b   : > { %1899 = vsyncadd (%p2062_p4), %s512_s28, 4294967264  ;;  %p2412_p8 = scmp.eq.s32.totalorder %s2053_s23, 0 }
  0x6d   : > { %1901 = dma.done.wait (%p2412_p8), [#allocation13], 256   ;;  %p2413_p5 = pmov %p2412_p8 }
  0x6f   : > { %1903 = vsyncadd (%p2413_p5), [#allocation13], 4294967040  ;;  %p2414_p7 = pmov %p2413_p5 }
  0x70   : > { %p2415_p9 = pmov %p2413_p5 }
  0x71   : > { %1905 = dma.done.wait (%p2414_p7), [#allocation16], 512  }
  0x72   : > { %1907 = vsyncadd (%p2415_p9), [#allocation16], 4294966784  ;;  %p2416_p10 = pmov %p2413_p5 }
  0x73   : > { %p2417_p0 = pmov %p2413_p5 }
  0x74   : > { %1909 = dma.done.wait (%p2416_p10), [#allocation19], 256  }
  0x75   : > { %1911 = vsyncadd (%p2417_p0), [#allocation19], 4294967040  ;;  %v1401_v0 = vld [vmem:[#allocation15 + $0x8] sm:$0xff]  ;;  %v1405_v1 = vld [vmem:[#allocation14 + $0x8] sm:$0xff]  ;;  %vm609_vm0 = vcmask 261120   ;;  %vm627_vm1 = vcmask 257024  }
  0x76   : > { %v1400_v2 = vld [vmem:[#allocation15] sm:$0xff]  ;;  %v1404_v3 = vld [vmem:[#allocation14] sm:$0xff]  ;;  %619 = vmatpush.bf16.msra.mxu0 %v1401_v0  ;;  %694 = vmatpush.bf16.msra.mxu2 %v1405_v1  ;;  %v1403_v7 = vld [vmem:[#allocation17 + $0x8] sm:$0xff]  ;;  %vm708_vm2 = vcmask 64512   ;;  %s1952_s23 = smov 112   ;;  %s1953_s25 = smov 120  }
  0x77   : > { %v2230_v4 = vld [vmem:[%s495_s1] sm:$0xff]  ;;  %v592_v6 = vld [vmem:[#allocation9] sm:$0xf]  ;;  %655 = vmatpush.bf16.msra.mxu1 %v1403_v7  ;;  %s1954_s14 = smov 104   ;;  %v629_v37 = vld [vmem:[#allocation11] sm:$0xf] }
  0x78   : > { %v667_v5 = vpack.c.bf16 %v2230_v4, %v2230_v4  ;;  %v1402_v10 = vld [vmem:[#allocation17] sm:$0xff]  ;;  %v665_v42 = vld [vmem:[%s2212_s12] sm:$0x3]  ;;  %v1955_v47 = vmov 0   ;;  %vm749_vm5 = vcmask 1043456   ;;  %s1345_s4 = sshll.u32 %s2196_s27, 4 }
  0x79   : > { %vm666_vm3 = vnez %v665_v42  ;;  %vm744_vm6 = vcmask 60416   ;;  %s2276_s29 = scalar_lea.vmem [#allocation21], %s1345_s4  ;;  %s1956_s30 = smov 8   ;;  %vm1001_vm7 = vcmask 130048   ;;  %vm1004_vm8 = vcmask 195584  }
  0x7a   : > { %620 = vmatpush.bf16.msra.mxu0 %v1400_v2  ;;  %695 = vmatpush.bf16.msra.mxu2 %v1404_v3  ;;  %v728_v48 = vsel %vm666_vm3, 16843009, %v1955_v47  ;;  %s1957_s9 = smov 24   ;;  %s1958_s5 = smov 16  }
  0x7b   : > { %656 = vmatpush.bf16.msra.mxu1 %v1402_v10  ;;  %v729_v49 = vunpack.c.0.s8 %v728_v48  ;;  %s1408_s11 = sshll.u32 %s1934_s20, 4  ;;  %s2420_s8 = sld [smem:[#allocation43_spill]] }
  0x7c   : > { %s1117_s13 = sshll.u32 %s2276_s29, 4  ;;  %s1089_s1 = scalar_lea.sflag [#allocation22], %s2196_s27  ;;  %s1118_s13 = int_to_ptr.vmem [resolvable:$true] %s1117_s13 }
  0x7d   : > { %1354 = vmatmul.msk.bf16.vlgmr.msra.gmra.mxu0 %vm609_vm0, %v592_v6  ;;  %1372 = vmatmul.msk.bf16.vlgmr.msra.gmra.mxu2 %vm609_vm0, %v667_v5  ;;  %vm2253_vm4 = vcmp.ne.s32.totalorder %v729_v49, 0 }
  0x7e   : > { %1363 = vmatmul.msk.bf16.vlgmr.msra.gmra.mxu1 %vm609_vm0, %v629_v37 }
  0x81   : > { %s1116_s10 = scalar_lea.hbm %s2420_s8, %s1408_s11 }
  0x82   : > { %s1119_s2 = sshll.u32 %s1116_s10, 4  ;;  %s1120_s2 = int_to_ptr.hbm [resolvable:$true] %s1119_s2 }
  0x83   : > { %s1822_s6 = sshra.s32 %s1120_s2, 4  ;;  %s1823_s6 = int_to_ptr.hbm [resolvable:$true] %s1822_s6 }
  0x84   : > { %s1824_s7 = scalar_lea.hbm %s1823_s6, 16  ;;  %p1829_p11 = scmp.lt.s32.totalorder %s1823_s6, %s2420_s8 }
  0x85   : > { %p1825_p4 = scmp.ne.s32.totalorder %s1823_s6, %s1824_s7 }
  0x87   : > { %p1826_p1 = pnand %p1825_p4, %p2171_p13 }
  0x89   : > { %p1827_p12 = pneg %p1826_p1 }
  0xfa   : > { %v622_v8 = vpop.f32.mrf.mxu0 }
  0xfb   : > { %v626_v9 = vpack.c.bf16 %v622_v8, %v622_v8  ;;  %v658_v56 = vpop.f32.mrf.mxu1 }
  0xfc   : > { %v662_v57 = vpack.c.bf16 %v658_v56, %v658_v56 }
  0xfd   : > { %628 = vst.msk [vmem:[#allocation2] sm:$0xf] %vm627_vm1, %v626_v9 }
  0xfe   : > { %663 = vst.msk [vmem:[#allocation3] sm:$0xf] %vm627_vm1, %v662_v57 }
 0x100   : > { %v697_v11 = vpop.f32.mrf.mxu2 }
 0x101   : > { %v701_v12 = vmul.f32 0.35355338, %v697_v11 }
 0x102   : > { %v624_v13 = vpop.f32.mrf.mxu0 }
 0x103   : > { %v702_v14 = vpack.c.bf16 %v701_v12, %v701_v12  ;;  %v660_v58 = vpop.f32.mrf.mxu1 }
 0x104   : > { %v706_v15 = vld [vmem:[#allocation2] sm:$0xf] }
 0x105   : > { %v840_v16 = vld [vmem:[#allocation2] sm:$0xf]  ;;  %704 = vst.msk [vmem:[#allocation4] sm:$0xf] %vm627_vm1, %v702_v14  ;;  %v713_v18 = vsel %vm708_vm2, %v706_v15, 0 }
 0x106   : > { %v768_v17 = vld [vmem:[#allocation2] sm:$0xf]  ;;  %v848_v19 = vunpack.c.l.b16 %v840_v16  ;;  %722 = vmatpush.bf16.xpose.msra.mxu3 %v713_v18  ;;  %v707_v59 = vld [vmem:[#allocation3] sm:$0xf] }
 0x107   : > { %v776_v20 = vunpack.c.l.b16 %v768_v17  ;;  %v912_v24 = vld [vmem:[#allocation2] sm:$0xf]  ;;  %v751_v60 = vsel %vm749_vm5, %v707_v59, 0  ;;  %v769_v15 = vld [vmem:[#allocation3] sm:$0xf] }
 0x108   : > { %v849_v21 = vpack.c.b16 %v848_v19, %v848_v19  ;;  %v699_v23 = vpop.f32.mrf.mxu2  ;;  %v920_v25 = vunpack.c.l.b16 %v912_v24  ;;  %760 = vmatpush.bf16.msrb.mxu0 %v751_v60  ;;  %v815_v16 = vunpack.c.l.b16 %v769_v15  ;;  %v841_v42 = vld [vmem:[#allocation3] sm:$0xf] }
 0x109   : > { %v777_v22 = vpack.c.b16 %v776_v20, %v776_v20  ;;  %v1407_v15 = vld [vmem:[#allocation18 + $0x8] sm:$0xff] }
 0x10a   : > { %850 = vrot.lane.b32.xlu1 %v849_v21, %s1952_s23  ;;  %v921_v32 = vpack.c.b16 %v920_v25, %v920_v25  ;;  %v816_v17 = vpack.c.b16 %v815_v16, %v815_v16  ;;  %v1406_v16 = vld [vmem:[#allocation18] sm:$0xff] }
 0x10b   : > { %778 = vrot.lane.b32.xlu0 %v777_v22, %s1953_s25 }
 0x10c   : > { %v705_v26 = vld [vmem:[#allocation4] sm:$0xf] }
 0x10d   : > { %v839_v27 = vld [vmem:[#allocation4] sm:$0xf]  ;;  %1373 = vmatmul.msk.bf16.vlgmr.msra.gmra.mxu3 %vm708_vm2, %v705_v26 }
 0x10e   : > { %v767_v28 = vld [vmem:[#allocation4] sm:$0xf]  ;;  %v843_v29 = vunpack.c.l.b16 %v839_v27 }
 0x10f   : > { %v771_v30 = vunpack.c.l.b16 %v767_v28  ;;  %v911_v34 = vld [vmem:[#allocation4] sm:$0xf] }
 0x110   : > { %v844_v31 = vpack.c.b16 %v843_v29, %v843_v29  ;;  %v915_v35 = vunpack.c.l.b16 %v911_v34 }
 0x111   : > { %v772_v33 = vpack.c.b16 %v771_v30, %v771_v30 }
 0x112   : > { %845 = vrot.lane.b32.xlu2 %v844_v31, %s1952_s23  ;;  %922 = vrot.lane.b32.xlu1 %v921_v32, %s1954_s14  ;;  %v916_v36 = vpack.c.b16 %v915_v35, %v915_v35 }
 0x113   : > { %773 = vrot.lane.b32.xlu0 %v772_v33, %s1953_s25 }
 0x11a   : > { %917 = vrot.lane.b32.xlu2 %v916_v36, %s1954_s14 }
 0x16c   : > { %v846_v43 = vpop.permute.xlu2 %845 }
 0x174   : > { %v918_v54 = vpop.permute.xlu2 %917 }
 0x17c   : > { %v851_v38 = vpop.permute.xlu1 %850 }
 0x17d   : > { %v779_v39 = vpop.permute.xlu0 %778  ;;  %v856_v41 = vsel %vm708_vm2, %v851_v38, 0 }
 0x17e   : > { %v784_v40 = vsel %vm708_vm2, %v779_v39, 0  ;;  %865 = vmatpush.bf16.xpose.msrb.mxu3 %v856_v41  ;;  %v913_v39 = vld [vmem:[#allocation3] sm:$0xf] }
 0x17f   : > { %793 = vmatpush.bf16.xpose.msrb.mxu1 %v784_v40  ;;  %v959_v40 = vunpack.c.l.b16 %v913_v39 }
 0x181   : > { %v960_v41 = vpack.c.b16 %v959_v40, %v959_v40 }
 0x184   : > { %v923_v44 = vpop.permute.xlu1 %922 }
 0x185   : > { %v928_v45 = vsel %vm708_vm2, %v923_v44, 0  ;;  %v774_v46 = vpop.permute.xlu0 %773  ;;  %1378 = vmatmul.msk.bf16.vlgmr.msrb.gmra.mxu3 %vm708_vm2, %v846_v43  ;;  %v887_v43 = vunpack.c.l.b16 %v841_v42 }
 0x186   : > { %1375 = vmatmul.msk.bf16.vlgmr.msrb.gmra.mxu1 %vm708_vm2, %v774_v46  ;;  %1035 = vmatpush.bf16.msra.mxu3 %v1407_v15 }
 0x187   : > { %937 = vmatpush.bf16.xpose.msra.mxu1 %v928_v45  ;;  %v888_v44 = vpack.c.b16 %v887_v43, %v887_v43 }
 0x18a   : > { %1036 = vmatpush.bf16.msra.mxu3 %v1406_v16 }
 0x190   : > { %v724_v51 = vpop.f32.mrf.mxu3 }
 0x191   : > { %v731_v52 = vsel %vm2253_vm4, -1e+09, %v724_v51 }
 0x192   : > { %v732_v53 = vsel %vm708_vm2, %v731_v52, -inf }
 0x193   : > { %733 = vmax.xlane.f32.xlu1 %v732_v53 }
 0x196   : > { %1381 = vmatmul.msk.bf16.vlgmr.msra.gmra.mxu1 %vm708_vm2, %v918_v54 }
 0x198   : > { %v726_v55 = vpop.f32.mrf.mxu3 }
 0x203   : > { %v795_v61 = vpop.f32.mrf.mxu1 }
 0x204   : > { %v799_v62 = vsel %vm2253_vm4, -1e+09, %v795_v61 }
 0x205   : > { %v800_v63 = vsel %vm708_vm2, %v799_v62, -inf }
 0x206   : > { %801 = vmax.xlane.f32.xlu0 %v800_v63  ;;  %v734_v0 = vpop.xlane.xlu1 %733 }
 0x207   : > { %v735_v1 = vsub.f32 %v731_v52, %v734_v0 }
 0x208   : > { %v867_v2 = vpop.f32.mrf.mxu3 }
 0x209   : > { %v736_v3 = vmul.f32 1.442695, %v735_v1  ;;  %v871_v12 = vsel %vm2253_vm4, -1e+09, %v867_v2 }
 0x20a   : > { %v872_v14 = vsel %vm708_vm2, %v871_v12, -inf }
 0x20b   : > { %v797_v5 = vpop.f32.mrf.mxu1  ;;  %1548 = vpow2.f32 %v736_v3 }
 0x210   : > { %v869_v6 = vpop.f32.mrf.mxu3 }
 0x211   : > { %v1549_v7 = vpop.eup %1548 }
 0x212   : > { %v738_v9 = vsel %vm708_vm2, %v1549_v7, 0.0 }
 0x213   : > { %v939_v8 = vpop.f32.mrf.mxu1  ;;  %739 = vadd.xlane.f32.xlu1 %v738_v9 }
 0x214   : > { %v943_v10 = vsel %vm2253_vm4, -1e+09, %v939_v8 }
 0x215   : > { %v944_v11 = vsel %vm708_vm2, %v943_v10, -inf }
 0x216   : > { %945 = vmax.xlane.f32.xlu2 %v944_v11 }
 0x21b   : > { %v941_v13 = vpop.f32.mrf.mxu1 }
 0x21e   : > { %873 = vmax.xlane.f32.xlu2 %v872_v14 }
 0x236   : > { %817 = vrot.lane.b32.xlu2 %v816_v17, %s1953_s25 }
 0x279   : > { %v802_v18 = vpop.xlane.xlu0 %801 }
 0x27a   : > { %v803_v19 = vsub.f32 %v799_v62, %v802_v18 }
 0x27c   : > { %v804_v20 = vmul.f32 1.442695, %v803_v19 }
 0x27e   : > { %1550 = vpow2.f32 %v804_v20 }
 0x284   : > { %v1551_v21 = vpop.eup %1550 }
 0x285   : > { %v806_v22 = vsel %vm708_vm2, %v1551_v21, 0.0 }
 0x286   : > { %807 = vadd.xlane.f32.xlu0 %v806_v22  ;;  %v740_v23 = vpop.xlane.xlu1 %739 }
 0x287   : > { %1552 = vrcp.f32 %v740_v23 }
 0x289   : > { %v946_v24 = vpop.xlane.xlu2 %945 }
 0x28a   : > { %v947_v25 = vsub.f32 %v943_v10, %v946_v24 }
 0x28c   : > { %v948_v26 = vmul.f32 1.442695, %v947_v25 }
 0x28d   : > { %v1553_v27 = vpop.eup %1552 }
 0x28e   : > { %1554 = vpow2.f32 %v948_v26  ;;  %v742_v28 = vmul.f32 %v1553_v27, %v1549_v7 }
 0x290   : > { %v743_v30 = vpack.c.bf16 %v742_v28, %v742_v28 }
 0x291   : > { %v874_v29 = vpop.xlane.xlu2 %873 }
 0x292   : > { %v875_v31 = vsub.f32 %v871_v12, %v874_v29  ;;  %745 = vst.msk [vmem:[%s2276_s29] sm:$0xf] %vm744_vm6, %v743_v30  ;;  %1374 = vmatmul.msk.bf16.vlgmr.msrb.gmra.mxu0 %vm708_vm2, %v743_v30  ;;  %v1959_v29 = vmov 32.0  }
 0x294   : > { %v1555_v32 = vpop.eup %1554  ;;  %v876_v33 = vmul.f32 1.442695, %v875_v31 }
 0x295   : > { %v950_v34 = vsel %vm708_vm2, %v1555_v32, 0.0 }
 0x296   : > { %1556 = vpow2.f32 %v876_v33  ;;  %951 = vadd.xlane.f32.xlu0 %v950_v34 }
 0x299   : > { %v818_v35 = vpop.permute.xlu2 %817 }
 0x29a   : > { %v823_v36 = vsel %vm749_vm5, %v818_v35, 0 }
 0x29b   : > { %832 = vmatpush.bf16.msrb.mxu2 %v823_v36 }
 0x29c   : > { %v1557_v37 = vpop.eup %1556 }
 0x29d   : > { %v878_v38 = vsel %vm708_vm2, %v1557_v37, 0.0 }
 0x29e   : > { %879 = vadd.xlane.f32.xlu1 %v878_v38 }
 0x2aa   : > { %961 = vrot.lane.b32.xlu0 %v960_v41, %s1954_s14 }
 0x2b7   : > { %889 = vrot.lane.b32.xlu1 %v888_v44, %s1952_s23  ;;  %s1828_s23 = scalar_lea.hbm %s2420_s8, 32 }
 0x2b8   : > { %p1830_p3 = scmp.lt.s32.totalorder %s1828_s23, %s1824_s7 }
 0x2ba   : > { %p1831_p2 = por %p1830_p3, %p1829_p11 }
 0x2bc   : > { %p1832_p8 = pnand %p1831_p2, %p1827_p12 }
 0x2f9   : > { %v808_v45 = vpop.xlane.xlu0 %807 }
 0x2fa   : > { %1558 = vrcp.f32 %v808_v45 }
 0x300   : > { %v1559_v46 = vpop.eup %1558 }
 0x301   : > { %v810_v47 = vmul.f32 %v1559_v46, %v1551_v21 }
 0x303   : > { %v811_v48 = vpack.c.bf16 %v810_v47, %v810_v47 }
 0x305   : > { %1376 = vst.msk [vmem:[%s2276_s29 + $0x4] sm:$0xf] %vm744_vm6, %v811_v48  ;;  %1377 = vmatmul.msk.bf16.vlgmr.msrb.gmra.mxu2 %vm708_vm2, %v811_v48 }
 0x309   : > { %v952_v49 = vpop.xlane.xlu0 %951 }
 0x30a   : > { %1560 = vrcp.f32 %v952_v49 }
 0x30f   : > { %v762_v51 = vpop.f32.mrf.mxu0 }
 0x310   : > { %v1561_v50 = vpop.eup %1560  ;;  %v766_v18 = vpack.c.bf16 %v762_v51, %v762_v51 }
 0x311   : > { %v954_v52 = vmul.f32 %v1561_v50, %v1555_v32  ;;  %v880_v53 = vpop.xlane.xlu1 %879 }
 0x312   : > { %1562 = vrcp.f32 %v880_v53 }
 0x313   : > { %v955_v54 = vpack.c.bf16 %v954_v52, %v954_v52  ;;  %1564 = vrcp.f32 %v1959_v29 }
 0x315   : > { %1382 = vst.msk [vmem:[%s2276_s29 + $0xc] sm:$0xf] %vm744_vm6, %v955_v54 }
 0x317   : > { %v764_v56 = vpop.f32.mrf.mxu0 }
 0x318   : > { %v1563_v55 = vpop.eup %1562 }
 0x319   : > { %v882_v57 = vmul.f32 %v1563_v55, %v1557_v37  ;;  %v1565_v30 = vpop.eup %1564 }
 0x31a   : > { %v1047_v31 = vmul.f32 32.0, %v1565_v30  ;;  %vm1051_vm9 = vweird.f32 %v1565_v30 }
 0x31b   : > { %v883_v58 = vpack.c.bf16 %v882_v57, %v882_v57 }
 0x31c   : > { %v962_v59 = vpop.permute.xlu0 %961  ;;  %v1048_v32 = vsub.f32 1.0, %v1047_v31 }
 0x31d   : > { %1379 = vst.msk [vmem:[%s2276_s29 + $0x8] sm:$0xf] %vm744_vm6, %v883_v58  ;;  %v967_v60 = vsel %vm749_vm5, %v962_v59, 0 }
 0x31e   : > { %976 = vmatpush.bf16.msra.mxu2 %v967_v60  ;;  %v1049_v33 = vmul.f32 %v1565_v30, %v1048_v32 }
 0x320   : > { %v1050_v34 = vadd.f32 %v1565_v30, %v1049_v33 }
 0x321   : > { %1383 = vmatmul.msk.bf16.vlgmr.msra.gmra.mxu2 %vm708_vm2, %v955_v54 }
 0x322   : > { %v1052_v35 = vsel %vm1051_vm9, %v1565_v30, %v1050_v34 }
 0x329   : > { %v890_v61 = vpop.permute.xlu1 %889 }
 0x32a   : > { %v895_v62 = vsel %vm749_vm5, %v890_v61, 0 }
 0x32b   : > { %904 = vmatpush.bf16.msra.mxu0 %v895_v62 }
 0x32e   : > { %1380 = vmatmul.msk.bf16.vlgmr.msra.gmra.mxu0 %vm708_vm2, %v883_v58 }
 0x388   : > { %v834_v63 = vpop.f32.mrf.mxu2 }
 0x389   : > { %v838_v0 = vpack.c.bf16 %v834_v63, %v834_v63 }
 0x38b   : > { %v984_v1 = vunpack.c.l.b16 %v838_v0 }
 0x38d   : > { %v985_v2 = vpack.c.b16 %v984_v1, %v984_v1 }
 0x38f   : > { %986 = vrot.lane.b32.xlu2 %v985_v2, %s1956_s30 }
 0x390   : > { %v836_v3 = vpop.f32.mrf.mxu2 }
 0x3a4   : > { %v978_v5 = vpop.f32.mrf.mxu2 }
 0x3a5   : > { %v982_v6 = vpack.c.bf16 %v978_v5, %v978_v5 }
 0x3a7   : > { %v994_v7 = vunpack.c.l.b16 %v982_v6 }
 0x3a9   : > { %v995_v8 = vpack.c.b16 %v994_v7, %v994_v7 }
 0x3ab   : > { %996 = vrot.lane.b32.xlu2 %v995_v8, %s1957_s9  ;;  %v906_v9 = vpop.f32.mrf.mxu0 }
 0x3ac   : > { %v910_v10 = vpack.c.bf16 %v906_v9, %v906_v9  ;;  %v980_v11 = vpop.f32.mrf.mxu2 }
 0x3ae   : > { %v989_v12 = vunpack.c.l.b16 %v910_v10 }
 0x3b0   : > { %v990_v13 = vpack.c.b16 %v989_v12, %v989_v12 }
 0x3b2   : > { %991 = vrot.lane.b32.xlu0 %v990_v13, %s1958_s5 }
 0x3b3   : > { %v908_v14 = vpop.f32.mrf.mxu0 }
 0x3e9   : > { %v987_v17 = vpop.permute.xlu2 %986 }
 0x3ea   : > { %v1000_v19 = vsel %vm708_vm2, %v766_v18, %v987_v17 }
 0x405   : > { %v997_v21 = vpop.permute.xlu2 %996 }
 0x424   : > { %v992_v20 = vpop.permute.xlu0 %991 }
 0x425   : > { %v1003_v22 = vsel %vm1001_vm7, %v1000_v19, %v992_v20 }
 0x426   : > { %v1006_v23 = vsel %vm1004_vm8, %v1003_v22, %v997_v21 }
 0x427   : > { %1008 = vst.msk [vmem:[#allocation5] sm:$0xf] %vm627_vm1, %v1006_v23 }
 0x42e   : > { %v1009_v24 = vld [vmem:[#allocation5] sm:$0xf] }
 0x42f   : > { %1392 = vmatmul.msk.bf16.vlgmr.msra.gmra.mxu3 %vm609_vm0, %v1009_v24 }
 0x4b2   : > { %v1038_v25 = vpop.f32.mrf.mxu3 }
 0x4b3   : > { %v1042_v26 = vadd.f32 %v1038_v25, %v2230_v4 }
 0x4b5   : > { %v1043_v27 = vsel %vm609_vm0, %v1042_v26, 0.0 }
 0x4b6   : > { %1044 = vadd.xlane.f32.xlu1 %v1043_v27 }
 0x4ba   : > { %v1040_v28 = vpop.f32.mrf.mxu3 }
 0x529   : > { %v1045_v36 = vpop.xlane.xlu1 %1044 }
 0x52a   : > { %v1053_v37 = vmul.f32 %v1052_v35, %v1045_v36 }
 0x52c   : > { %v1054_v4 = vsub.f32 %v1042_v26, %v1053_v37 }
 0x52e   : > { %v1055_v38 = vmul.f32 %v1054_v4, %v1054_v4 }
 0x530   : > { %v1056_v39 = vsel %vm609_vm0, %v1055_v38, 0.0 }
 0x531   : > { %1057 = vadd.xlane.f32.xlu0 %v1056_v39 }
 0x532   : > { %1835 = shalt.err (!%p1832_p8)
}
 0x533   : > { %s1960_s4 = smov 64   ;;  %s1961_s29 = smov 4  }
 0x534   : > { %1434 = dma.vmem_to_hbm [thread:$0]  (%p2171_p13), %s1118_s13, 256, %s1120_s2, %s1089_s1, %s1960_s4, %s1960_s4, %s1961_s29  }
 0x535   : > { %s1395_s30 = sshll.u32 %s1934_s20, 3  ;;  %s2421_s11 = sld [smem:[#allocation40_spill]] }
 0x536   : > { %s2422_s10 = sld [smem:[#allocation42_spill]]  ;;  %s577_s20 = scalar_lea.vmem [#allocation20], %s1338_s26 }
 0x537   : > { %s2423_s6 = sld [smem:[#allocation41_spill]]  ;;  %s1102_s7 = sshll.u32 %s577_s20, 4  ;;  %s1103_s7 = int_to_ptr.vmem [resolvable:$true] %s1102_s7 }
 0x538   : > { %s1084_s12 = scalar_lea.sflag [#allocation8], %s2196_s27 }
 0x53b   : > { %v1546_v49 = vld [vmem:[%s2421_s11] ss:$0 sm:$0xff] }
 0x53c   : > { %s1100_s13 = scalar_lea.hbm %s2422_s10, %s1395_s30  ;;  %s1856_s26 = scalar_lea.hbm %s2422_s10, 16 }
 0x53d   : > { %v1547_v52 = vld [vmem:[%s2423_s6] ss:$0 sm:$0xff]  ;;  %s1104_s28 = sshll.u32 %s1100_s13, 4  ;;  %s1105_s28 = int_to_ptr.hbm [resolvable:$true] %s1104_s28 }
 0x53e   : > { %s1850_s23 = sshra.s32 %s1105_s28, 4  ;;  %s1851_s23 = int_to_ptr.hbm [resolvable:$true] %s1850_s23 }
 0x53f   : > { %s1852_s25 = scalar_lea.hbm %s1851_s23, 8  ;;  %p1857_p10 = scmp.lt.s32.totalorder %s1851_s23, %s2422_s10 }
 0x540   : > { %p1853_p5 = scmp.ne.s32.totalorder %s1851_s23, %s1852_s25  ;;  %p1858_p0 = scmp.lt.s32.totalorder %s1856_s26, %s1852_s25 }
 0x542   : > { %p1854_p7 = pnand %p1853_p5, %p2171_p13  ;;  %p1859_p4 = por %p1858_p0, %p1857_p10 }
 0x544   : > { %p1855_p9 = pneg %p1854_p7 }
 0x546   : > { %p1860_p1 = pnand %p1859_p4, %p1855_p9 }
 0x5a4   : > { %v1058_v40 = vpop.xlane.xlu0 %1057 }
 0x5a5   : > { %v1059_v41 = vmul.f32 %v1058_v40, %v1052_v35 }
 0x5a7   : > { %v1060_v42 = vadd.f32 1e-05, %v1059_v41 }
 0x5a9   : > { %1566 = vrsqrt.f32 %v1060_v42  ;;  %vm1067_vm11 = vweird.f32 %v1060_v42 }
 0x5af   : > { %v1567_v43 = vpop.eup %1566 }
 0x5b0   : > { %v1062_v44 = vmul.f32 %v1567_v43, %v1060_v42  ;;  %vm1068_vm10 = vweird.f32 %v1567_v43 }
 0x5b1   : > { %vm1069_vm12 = vmor %vm1067_vm11, %vm1068_vm10 }
 0x5b2   : > { %v1063_v45 = vmul.f32 %v1567_v43, %v1062_v44 }
 0x5b4   : > { %v1064_v46 = vmul.f32 0.5, %v1063_v45 }
 0x5b6   : > { %v1065_v47 = vsub.f32 1.5, %v1064_v46 }
 0x5b8   : > { %v1066_v48 = vmul.f32 %v1567_v43, %v1065_v47 }
 0x5ba   : > { %v1070_v50 = vsel %vm1069_vm12, %v1567_v43, %v1066_v48 }
 0x5bb   : > { %v1071_v51 = vmul.f32 %v1070_v50, %v1054_v4 }
 0x5bd   : > { %v1076_v53 = vmul.f32 %v1546_v49, %v1071_v51 }
 0x5bf   : > { %v1081_v54 = vadd.f32 %v1547_v52, %v1076_v53 }
 0x5c1   : > { %1082 = vst.msk [vmem:[%s577_s20] sm:$0xff] %vm609_vm0, %v1081_v54 }
 0x5c2   : > { %1863 = shalt.err (!%p1860_p1)
}
 0x5c3   : > { %1433 = dma.vmem_to_hbm [thread:$0]  (%p2171_p13), %s1103_s7, 128, %s1105_s28, %s1084_s12  }
 0x5c4 PF: > { %s2424_s27 = sld [smem:[#allocation31_spill]]  ;;  %p2426_p12 = scmp.ge.s32.totalorder %s1942_s22, 2 }
 0x5c6   : > { %p1464_p11 = pnand %p2426_p12, %p2067_p6 }
 0x5c8   : > { %p1465_p3 = pneg %p1464_p11 }
 0x5ca   : > { %s1134_s5 = sand.u32 1, %s2424_s27  }
 0x5cb   : > { %s1135_s11 = scalar_lea.sflag [#allocation8], %s1134_s5 }
 0x5cc   : > { %1913 = dma.done.wait (%p1465_p3), %s1135_s11, 128  }
 0x5cd   : > { %1915 = vsyncadd (%p1465_p3), %s1135_s11, 4294967168  ;;  %s1145_s16 = scalar_lea.sflag [#allocation22], %s1134_s5 }
 0x5ce   : > { %1917 = dma.done.wait (%p1465_p3), %s1145_s16, 256  }
 0x5cf   : > { %1919 = vsyncadd (%p1465_p3), %s1145_s16, 4294967040  ;;  %s37_s22 = sadd.s32 1, %s1942_s22   ;;  %s2427_s24 = sld [smem:[#allocation33_spill]] }
 0x5d0   : > { %p34_p2 = scmp.ge.s32.totalorder %s37_s22, 4   ;;  %s2428_s17 = smov %s1926_s18 }
 0x5d1   : > { %s2429_s18 = smov %s1930_s19  ;;  %s2430_s19 = smov %s2180_s15 }
 0x5d2   : > { %s2431_s20 = smov %s1938_s21  ;;  %36 = sbr.rel (!%p34_p2) target bundleno = 24 (0x18), region = 168 }
 0x5d5   : > { %s2432_s21 = smov %s2427_s24 }
 0x5d7   :  { %1151 = vsyncpa [#allocation7], 1 }
 0x5d8   :  { %1153 = vsyncpa [#allocation7 + $0x1], 1 }
 0x5d9   :  { %1154 = vsyncpa [#allocation10], 1 }
 0x5da   :  { %1155 = vsyncpa [#allocation13], 1 }
 0x5db   :  { %1157 = vsyncpa [#allocation13 + $0x1], 1 }
 0x5dc   :  { %1158 = vsyncpa [#allocation16], 1 }
 0x5dd   :  { %1159 = vsyncpa [#allocation19], 1 }
 0x5de   :  { %1160 = vsyncpa [#allocation8], 1 }
 0x5df   :  { %1162 = vsyncpa [#allocation8 + $0x1], 1 }
 0x5e0   :  { %1163 = vsyncpa [#allocation22], 1 }
 0x5e1   :  { %1165 = vsyncpa [#allocation22 + $0x1], 1 }

// kernel: tpu_custom_call.1
= control target key start
LH: loop header
LB: loop body
LE: loop exit
PB: predicated region body
PF: predicated region fallthrough
CT: control target
= control target key end

     0   :  { %s2412_s0 = inlined_call_operand.hbm [shape: f32[2,8,32], index: 0, kind: input, shape index: {}]   ;;  %s2413_s1 = inlined_call_operand.hbm [shape: bf16[2,8,32], index: 1, kind: input, shape index: {}]   ;;  %s2414_s2 = inlined_call_operand.hbm [shape: bf16[2,8,32], index: 2, kind: input, shape index: {}]   ;;  %s2415_s3 = inlined_call_operand.hbm [shape: s8[2,8,8], index: 3, kind: input, shape index: {}]   ;;  %s2416_s4 = inlined_call_operand.hbm [shape: bf16[32,32], index: 4, kind: input, shape index: {}]   ;;  %s2417_s5 = inlined_call_operand.hbm [shape: bf16[32,32], index: 5, kind: input, shape index: {}]   ;;  %s2418_s6 = inlined_call_operand.hbm [shape: bf16[32,32], index: 6, kind: input, shape index: {}]   ;;  %s2419_s7 = inlined_call_operand.hbm [shape: bf16[32,32], index: 7, kind: input, shape index: {}]   ;;  %s2420_s8 = inlined_call_operand.vmem [shape: f32[1,32], index: 8, kind: input, shape index: {}]   ;;  %s2421_s9 = inlined_call_operand.vmem [shape: f32[1,32], index: 9, kind: input, shape index: {}]   ;;  %s2422_s10 = inlined_call_operand.hbm [shape: f32[2,8,32], index: 10, kind: output, shape index: {0}]   ;;  %s2423_s11 = inlined_call_operand.hbm [shape: bf16[2,4,8,8], index: 11, kind: output, shape index: {1}]  }
   0x1   :  { %2439 = sst [smem:[#allocation38_spill]] %s2413_s1 }
   0x2   :  { %2440 = sst [smem:[#allocation39_spill]] %s2416_s4 }
   0x3   :  { %2441 = sst [smem:[#allocation40_spill]] %s2417_s5 }
   0x4   :  { %2442 = sst [smem:[#allocation41_spill]] %s2420_s8 }
   0x5   :  { %2443 = sst [smem:[#allocation42_spill]] %s2421_s9 }
   0x6   :  { %2444 = sst [smem:[#allocation43_spill]] %s2422_s10 }
   0x7   :  { %2445 = sst [smem:[#allocation44_spill]] %s2423_s11 }
   0x8   :  { %17 = vsyncpa [#allocation7], 0 }
   0x9   :  { %19 = vsyncpa [#allocation7 + $0x1], 0 }
   0xa   :  { %20 = vsyncpa [#allocation10], 0 }
   0xb   :  { %22 = vsyncpa [#allocation10 + $0x1], 0 }
   0xc   :  { %23 = vsyncpa [#allocation13], 0 }
   0xd   :  { %25 = vsyncpa [#allocation13 + $0x1], 0 }
   0xe   :  { %26 = vsyncpa [#allocation16], 0 }
   0xf   :  { %27 = vsyncpa [#allocation19], 0 }
  0x10   :  { %28 = vsyncpa [#allocation8], 0 }
  0x11   :  { %30 = vsyncpa [#allocation8 + $0x1], 0 }
  0x12   :  { %31 = vsyncpa [#allocation22], 0 }
  0x13   :  { %33 = vsyncpa [#allocation22 + $0x1], 0  ;;  %s2074_s17 = smov 0   ;;  %s2076_s18 = smov 0  }
  0x14   :  { %s2078_s19 = smov 0   ;;  %s2080_s20 = smov 0  }
  0x15   :  { %s2082_s21 = smov 0   ;;  %s2084_s22 = smov 0  }
  0x16 LB: > { %2446 = sst [smem:[#allocation31_spill]] %s1976_s17  ;;  %s2105_s23 = sadd.s32 4294967295, %s1996_s22   ;;  %s1996_s22 = sphi %s2084_s22, %s39_s22   ;;  %s1992_s21 = sphi %s2082_s21, %s2483_s21   ;;  %s1988_s20 = sphi %s2080_s20, %s2482_s20   ;;  %s1984_s19 = sphi %s2078_s19, %s2478_s19   ;;  %s1980_s18 = sphi %s2076_s18, %s2481_s18   ;;  %s1976_s17 = sphi %s2074_s17, %s2480_s17  }
  0x17   : > { %2447 = sst [smem:[#allocation32_spill]] %s1984_s19  ;;  %s1376_s24 = sadd.s32 4294967294, %s1996_s22  }
  0x18   : > { %2448 = sst [smem:[#allocation33_spill]] %s1988_s20  ;;  %p73_p0 = scmp.ne.s32.totalorder %s1980_s18, %s1976_s17 }
  0x19   : > { %p74_p1 = scmp.eq.s32.totalorder %s2105_s23, 0  ;;  %p305_p2 = scmp.eq.s32.totalorder %s2105_s23, 1 }
  0x1a   : > { %p311_p3 = scmp.eq.s32.totalorder %s1376_s24, 1  ;;  %p1377_p5 = scmp.ge.s32.totalorder %s1996_s22, 1 }
  0x1b   : > { %p2114_p4 = por %p74_p1, %p73_p0  ;;  %p346_p7 = scmp.lt.s32.totalorder %s1996_s22, 3 }
  0x1c   : > { %p2119_p6 = por %p311_p3, %p73_p0  ;;  %s2452_s4 = sld [smem:[#allocation39_spill]] }
  0x1d   : > { %p2127_p8 = pnand %p1377_p5, %p346_p7  ;;  %s1998_s12 = smov [#allocation14]  }
  0x1e   : > { %s2450_s26 = scalar_select %p2119_p6, 1, 0 }
  0x1f   : > { %p1493_p9 = pneg %p2127_p8  ;;  %s359_s13 = sshll.u32 %s1998_s12, 4  ;;  %s360_s13 = int_to_ptr.vmem [resolvable:$true] %s359_s13 }
  0x20   : > { %2451 = sst [smem:[#allocation34_spill]] %s2450_s26  ;;  %s2424_s27 = smov 64  }
  0x21   : > { %p2135_p10 = pnand %p1493_p9, %p74_p1  ;;  %s2455_s5 = sld [smem:[#allocation40_spill]] }
  0x22   : > { %s357_s29 = sshll.u32 %s2452_s4, 4  ;;  %s2426_s28 = smov 4   ;;  %s358_s29 = int_to_ptr.hbm [resolvable:$true] %s357_s29 }
  0x23   : > { %1496 = dma.hbm_to_vmem [thread:$0]  (!%p2135_p10), %s358_s29, 256, %s360_s13, [#allocation13], %s2424_s27, %s2424_s27, %s2426_s28  }
  0x24   : > { %s2001_s12 = smov [#allocation15]   ;;  %s51_s15 = sadd.s32 1, %s1992_s21 }
  0x25   : > { %s373_s4 = sshll.u32 %s2001_s12, 4  ;;  %s60_s16 = sadd.s32 1, %s1984_s19  ;;  %s374_s4 = int_to_ptr.vmem [resolvable:$true] %s373_s4 }
  0x26   : > { %p53_p12 = scmp.ge.s32.totalorder %s51_s15, 2  ;;  %p67_p13 = scmp.ne.s32.totalorder %s1984_s19, %s1980_s18 }
  0x27   : > { %s371_s24 = sshll.u32 %s2455_s5, 4  ;;  %p68_p0 = scmp.eq.s32.totalorder %s1996_s22, 0  ;;  %s372_s24 = int_to_ptr.hbm [resolvable:$true] %s371_s24 }
  0x28   : > { %1499 = dma.hbm_to_vmem [thread:$0]  (!%p2135_p10), %s372_s24, 256, %s374_s4, [#allocation16], %s2424_s27, %s2424_s27, %s2426_s28  }
  0x29   : > { %p1530_p3 = scmp.lt.s32.totalorder %s1996_s22, 2  ;;  %s2485_s15 = smov (%p53_p12, %s51_s15), 0 }
  0x2a   : > { %2456 = sst [smem:[#allocation35_spill]] %s2485_s15  ;;  %p69_p5 = por %p68_p0, %p67_p13 }
  0x2b   : > { %p2163_p7 = por %p305_p2, %p67_p13  ;;  %s55_s13 = ssub.s32 %s1992_s21, %s2485_s15 }
  0x2c   : > { %s2170_s4 = sand.u32 1, %s1984_s19   ;;  %p58_p9 = scmp.eq.s32.totalorder %s55_s13, 0 }
  0x2d   : > { %s2457_s29 = scalar_select %p2163_p7, 1, 0 }
  0x2e   : > { %p2172_p11 = pnand %p1530_p3, %p69_p5  ;;  %s2435_s12 = sand.u32 1, %s1996_s22  }
  0x2f   : > { %2458 = sst [smem:[#allocation36_spill]] %s2457_s29  ;;  %s2432_s27 = sshll.u32 %s2170_s4, 2 }
  0x30   : > { %s2179_s28 = scalar_select %p58_p9, %s1984_s19, %s60_s16  }
  0x31   : > { %s1386_s5 = sshll.u32 %s1992_s21, 2  ;;  %s2461_s1 = sld [smem:[#allocation38_spill]] }
  0x32   : > { %2460 = sst [smem:[#allocation37_spill]] %s2179_s28  ;;  %s445_s9 = scalar_lea.vmem [#allocation9], %s2432_s27 }
  0x33   : > { %s453_s10 = sshll.u32 %s445_s9, 4  ;;  %s2189_s13 = scalar_lea.sflag [#allocation10], %s2435_s12  ;;  %s454_s10 = int_to_ptr.vmem [resolvable:$true] %s453_s10 }
  0x34   : > { %s468_s17 = scalar_lea.hbm %s2414_s2, %s1386_s5  ;;  %s385_s9 = sshll.u32 %s2418_s6, 4  ;;  %s386_s9 = int_to_ptr.hbm [resolvable:$true] %s385_s9 }
  0x35   : > { %s399_s12 = sshll.u32 %s2419_s7, 4  ;;  %s2462_s29 = smov 4   ;;  %s400_s12 = int_to_ptr.hbm [resolvable:$true] %s399_s12 }
  0x36   : > { %s2463_s20 = smov 64   ;;  %s422_s14 = scalar_lea.sflag [#allocation7], %s2170_s4 }
  0x37   : > { %s449_s15 = scalar_lea.hbm %s2461_s1, %s1386_s5  ;;  %s2003_s5 = smov [#allocation18]  }
  0x38   : > { %s451_s8 = sshll.u32 %s449_s15, 4  ;;  %s2002_s15 = smov [#allocation17]   ;;  %s452_s8 = int_to_ptr.hbm [resolvable:$true] %s451_s8 }
  0x39   : > { %1512 = dma.hbm_to_vmem [thread:$0]  (!%p2172_p11), %s452_s8, 64, %s454_s10, %s2189_s13  }
  0x3a   : > { %s387_s27 = sshll.u32 %s2002_s15, 4  ;;  %s401_s1 = sshll.u32 %s2003_s5, 4  ;;  %s388_s27 = int_to_ptr.vmem [resolvable:$true] %s387_s27  ;;  %s402_s1 = int_to_ptr.vmem [resolvable:$true] %s401_s1 }
  0x3b   : > { %1502 = dma.hbm_to_vmem [thread:$0]  (!%p2135_p10), %s386_s9, 256, %s388_s27, [#allocation16], %s2463_s20, %s2463_s20, %s2462_s29  }
  0x3c   : > { %s1383_s8 = sshll.u32 %s2170_s4, 3  ;;  %s1384_s10 = sshll.u32 %s1992_s21, 3 }
  0x3d   : > { %1505 = dma.hbm_to_vmem [thread:$0]  (!%p2135_p10), %s400_s12, 256, %s402_s1, [#allocation19], %s2463_s20, %s2463_s20, %s2462_s29  }
  0x3e   : > { %s430_s27 = scalar_lea.hbm %s2412_s0, %s1384_s10  ;;  %s425_s28 = scalar_lea.vmem [#allocation6], %s1383_s8 }
  0x3f   : > { %s434_s16 = sshll.u32 %s425_s28, 4  ;;  %s432_s26 = sshll.u32 %s430_s27, 4  ;;  %s435_s16 = int_to_ptr.vmem [resolvable:$true] %s434_s16  ;;  %s433_s26 = int_to_ptr.hbm [resolvable:$true] %s432_s26 }
  0x40   : > { %s470_s9 = sshll.u32 %s468_s17, 4  ;;  %s2464_s20 = sshll.u32 %s2170_s4, 2  ;;  %s471_s9 = int_to_ptr.hbm [resolvable:$true] %s470_s9 }
  0x41   : > { %1509 = dma.hbm_to_vmem [thread:$0]  (!%p2172_p11), %s433_s26, 128, %s435_s16, %s422_s14  }
  0x42   : > { %s464_s29 = scalar_lea.vmem [#allocation11], %s2464_s20  ;;  %s1389_s15 = sshll.u32 %s2170_s4, 1 }
  0x43   : > { %s472_s12 = sshll.u32 %s464_s29, 4  ;;  %s1390_s5 = sshll.u32 %s1992_s21, 1  ;;  %s473_s12 = int_to_ptr.vmem [resolvable:$true] %s472_s12 }
  0x44   : > { %1515 = dma.hbm_to_vmem [thread:$0]  (!%p2172_p11), %s471_s9, 64, %s473_s12, %s2189_s13  }
  0x45   : > { %s488_s10 = scalar_lea.hbm %s2415_s3, %s1390_s5  ;;  %s483_s11 = scalar_lea.vmem [#allocation12], %s1389_s15 }
  0x46   : > { %s492_s17 = sshll.u32 %s483_s11, 4  ;;  %s490_s19 = sshll.u32 %s488_s10, 4  ;;  %s493_s17 = int_to_ptr.vmem [resolvable:$true] %s492_s17  ;;  %s491_s19 = int_to_ptr.hbm [resolvable:$true] %s490_s19 }
  0x47   : > { %s2465_s27 = sand.u32 1, %s1996_s22   ;;  %501 = sbr.rel (%p2127_p8) target bundleno = 1448 (0x5a8), region = 60 }
  0x48   : > { %s480_s28 = scalar_lea.sflag [#allocation13], %s2465_s27  ;;  %s2238_s4 = sand.u32 (!%p2127_p8), 1, %s1980_s18  }
  0x49   : > { %1518 = dma.hbm_to_vmem [thread:$0]  (!%p2172_p11), %s491_s19, 32, %s493_s17, %s480_s28  }
  0x4a   : > { %s1392_s13 = sshll.u32 (!%p2127_p8), %s2238_s4, 3  ;;  %s504_s16 = scalar_lea.sflag (!%p2127_p8), [#allocation7], %s2238_s4 }
  0x4b   : > { %s507_s26 = scalar_lea.vmem (!%p2127_p8), [#allocation6], %s1392_s13 }
  0x4c   : > { %1943 = dma.done.wait (%p2114_p4), %s504_s16, 128  }
  0x4d   : > { %1945 = vsyncadd (%p2114_p4), %s504_s16, 4294967168  ;;  %s513_s30 = sand.u32 1, %s2105_s23   ;;  %s1393_s24 = sshll.u32 %s2238_s4, 2 }
  0x4e   : > { %s514_s9 = scalar_lea.sflag [#allocation10], %s513_s30  ;;  %s517_s14 = scalar_lea.vmem [#allocation9], %s1393_s24 }
  0x4f   : > { %1947 = dma.done.wait (%p2114_p4), %s514_s9, 128  }
  0x50   : > { %1949 = vsyncadd (%p2114_p4), %s514_s9, 4294967168  ;;  %s1395_s20 = sshll.u32 %s2238_s4, 1  ;;  %s2255_s29 = scalar_lea.vmem [#allocation11], %s1393_s24 }
  0x51   : > { %s534_s12 = scalar_lea.sflag [#allocation13], %s513_s30  ;;  %s2257_s15 = scalar_lea.vmem [#allocation12], %s1395_s20 }
  0x52   : > { %1951 = dma.done.wait (%p2114_p4), %s534_s12, 32  }
  0x53   : > { %1953 = vsyncadd (%p2114_p4), %s534_s12, 4294967264 }
  0x54   : > { %1955 = dma.done.wait (%p74_p1), [#allocation13], 256  }
  0x55   : > { %1957 = vsyncadd (%p74_p1), [#allocation13], 4294967040 }
  0x56   : > { %1959 = dma.done.wait (%p74_p1), [#allocation16], 512  }
  0x57   : > { %1961 = vsyncadd (%p74_p1), [#allocation16], 4294966784 }
  0x58   : > { %1963 = dma.done.wait (%p74_p1), [#allocation19], 256  }
  0x59   : > { %1965 = vsyncadd (%p74_p1), [#allocation19], 4294967040  ;;  %v1457_v0 = vld [vmem:[#allocation15 + $0x8] sm:$0xff]  ;;  %v1461_v1 = vld [vmem:[#allocation14 + $0x8] sm:$0xff]  ;;  %vm641_vm0 = vcmask 261120   ;;  %vm659_vm1 = vcmask 257024  }
  0x5a   : > { %v1456_v2 = vld [vmem:[#allocation15] sm:$0xff]  ;;  %v1460_v3 = vld [vmem:[#allocation14] sm:$0xff]  ;;  %651 = vmatpush.bf16.msra.mxu0 %v1457_v0  ;;  %726 = vmatpush.bf16.msra.mxu2 %v1461_v1  ;;  %v1459_v7 = vld [vmem:[#allocation17 + $0x8] sm:$0xff]  ;;  %vm740_vm2 = vcmask 64512   ;;  %s2004_s23 = smov 112   ;;  %s2005_s25 = smov 120  }
  0x5b   : > { %v2275_v4 = vld [vmem:[%s507_s26] sm:$0xff]  ;;  %v624_v6 = vld [vmem:[%s517_s14] sm:$0xf]  ;;  %687 = vmatpush.bf16.msra.mxu1 %v1459_v7  ;;  %s2006_s5 = smov 104   ;;  %v661_v37 = vld [vmem:[%s2255_s29] sm:$0xf] }
  0x5c   : > { %v699_v5 = vpack.c.bf16 %v2275_v4, %v2275_v4  ;;  %v1458_v10 = vld [vmem:[#allocation17] sm:$0xff]  ;;  %v697_v42 = vld [vmem:[%s2257_s15] sm:$0x3]  ;;  %v2007_v47 = vmov 0   ;;  %vm781_vm5 = vcmask 1043456   ;;  %s1401_s1 = sshll.u32 %s2238_s4, 4 }
  0x5d   : > { %vm698_vm3 = vnez %v697_v42  ;;  %vm776_vm6 = vcmask 60416   ;;  %s2322_s8 = scalar_lea.vmem [#allocation21], %s1401_s1  ;;  %s2008_s10 = smov 8   ;;  %vm1033_vm7 = vcmask 130048   ;;  %vm1036_vm8 = vcmask 195584  }
  0x5e   : > { %652 = vmatpush.bf16.msra.mxu0 %v1456_v2  ;;  %727 = vmatpush.bf16.msra.mxu2 %v1460_v3  ;;  %v760_v48 = vsel %vm698_vm3, 16843009, %v2007_v47  ;;  %s2009_s11 = smov 24   ;;  %s2010_s17 = smov 16  }
  0x5f   : > { %688 = vmatpush.bf16.msra.mxu1 %v1458_v10  ;;  %v761_v49 = vunpack.c.0.s8 %v760_v48  ;;  %s2468_s19 = sld [smem:[#allocation33_spill]]  ;;  %s1149_s9 = sshll.u32 %s2322_s8, 4  ;;  %s1150_s9 = int_to_ptr.vmem [resolvable:$true] %s1149_s9 }
  0x60   : > { %s2470_s30 = sld [smem:[#allocation44_spill]]  ;;  %s1121_s20 = scalar_lea.sflag [#allocation22], %s2238_s4 }
  0x61   : > { %1410 = vmatmul.msk.bf16.vlgmr.msra.gmra.mxu0 %vm641_vm0, %v624_v6  ;;  %1428 = vmatmul.msk.bf16.vlgmr.msra.gmra.mxu2 %vm641_vm0, %v699_v5  ;;  %vm2299_vm4 = vcmp.ne.s32.totalorder %v761_v49, 0 }
  0x62   : > { %1419 = vmatmul.msk.bf16.vlgmr.msra.gmra.mxu1 %vm641_vm0, %v661_v37 }
  0x65   : > { %s1464_s28 = sshll.u32 %s2468_s19, 4 }
  0x66   : > { %s1148_s24 = scalar_lea.hbm %s2470_s30, %s1464_s28 }
  0x67   : > { %s1151_s14 = sshll.u32 %s1148_s24, 4  ;;  %s1152_s14 = int_to_ptr.hbm [resolvable:$true] %s1151_s14 }
  0x68   : > { %s1876_s29 = sshra.s32 %s1152_s14, 4  ;;  %s1877_s29 = int_to_ptr.hbm [resolvable:$true] %s1876_s29 }
  0x69   : > { %s1878_s12 = scalar_lea.hbm %s1877_s29, 16  ;;  %p1883_p8 = scmp.lt.s32.totalorder %s1877_s29, %s2470_s30 }
  0x6a   : > { %p1879_p1 = scmp.ne.s32.totalorder %s1877_s29, %s1878_s12 }
  0x6c   : > { %p1880_p2 = pnand %p1879_p1, %p2163_p7 }
  0x6e   : > { %p1881_p4 = pneg %p1880_p2 }
  0xde   : > { %v654_v8 = vpop.f32.mrf.mxu0 }
  0xdf   : > { %v658_v9 = vpack.c.bf16 %v654_v8, %v654_v8  ;;  %v690_v56 = vpop.f32.mrf.mxu1 }
  0xe0   : > { %v694_v57 = vpack.c.bf16 %v690_v56, %v690_v56 }
  0xe1   : > { %660 = vst.msk [vmem:[#allocation2] sm:$0xf] %vm659_vm1, %v658_v9 }
  0xe2   : > { %695 = vst.msk [vmem:[#allocation3] sm:$0xf] %vm659_vm1, %v694_v57 }
  0xe4   : > { %v729_v11 = vpop.f32.mrf.mxu2 }
  0xe5   : > { %v733_v12 = vmul.f32 0.35355338, %v729_v11 }
  0xe6   : > { %v656_v13 = vpop.f32.mrf.mxu0 }
  0xe7   : > { %v734_v14 = vpack.c.bf16 %v733_v12, %v733_v12  ;;  %v692_v58 = vpop.f32.mrf.mxu1 }
  0xe8   : > { %v738_v15 = vld [vmem:[#allocation2] sm:$0xf] }
  0xe9   : > { %v872_v16 = vld [vmem:[#allocation2] sm:$0xf]  ;;  %736 = vst.msk [vmem:[#allocation4] sm:$0xf] %vm659_vm1, %v734_v14  ;;  %v745_v18 = vsel %vm740_vm2, %v738_v15, 0 }
  0xea   : > { %v800_v17 = vld [vmem:[#allocation2] sm:$0xf]  ;;  %v880_v19 = vunpack.c.l.b16 %v872_v16  ;;  %754 = vmatpush.bf16.xpose.msra.mxu3 %v745_v18  ;;  %v739_v59 = vld [vmem:[#allocation3] sm:$0xf] }
  0xeb   : > { %v808_v20 = vunpack.c.l.b16 %v800_v17  ;;  %v944_v24 = vld [vmem:[#allocation2] sm:$0xf]  ;;  %v783_v60 = vsel %vm781_vm5, %v739_v59, 0  ;;  %v801_v15 = vld [vmem:[#allocation3] sm:$0xf] }
  0xec   : > { %v881_v21 = vpack.c.b16 %v880_v19, %v880_v19  ;;  %v731_v23 = vpop.f32.mrf.mxu2  ;;  %v952_v25 = vunpack.c.l.b16 %v944_v24  ;;  %792 = vmatpush.bf16.msrb.mxu0 %v783_v60  ;;  %v847_v16 = vunpack.c.l.b16 %v801_v15  ;;  %v873_v42 = vld [vmem:[#allocation3] sm:$0xf]  ;;  %v1463_v15 = vld [vmem:[#allocation18 + $0x8] sm:$0xff] }
  0xed   : > { %v809_v22 = vpack.c.b16 %v808_v20, %v808_v20 }
  0xee   : > { %882 = vrot.lane.b32.xlu1 %v881_v21, %s2004_s23  ;;  %v953_v32 = vpack.c.b16 %v952_v25, %v952_v25  ;;  %v848_v17 = vpack.c.b16 %v847_v16, %v847_v16  ;;  %v1462_v16 = vld [vmem:[#allocation18] sm:$0xff] }
  0xef   : > { %810 = vrot.lane.b32.xlu0 %v809_v22, %s2005_s25 }
  0xf0   : > { %v737_v26 = vld [vmem:[#allocation4] sm:$0xf] }
  0xf1   : > { %v871_v27 = vld [vmem:[#allocation4] sm:$0xf]  ;;  %1429 = vmatmul.msk.bf16.vlgmr.msra.gmra.mxu3 %vm740_vm2, %v737_v26 }
  0xf2   : > { %v799_v28 = vld [vmem:[#allocation4] sm:$0xf]  ;;  %v875_v29 = vunpack.c.l.b16 %v871_v27 }
  0xf3   : > { %v803_v30 = vunpack.c.l.b16 %v799_v28  ;;  %v943_v34 = vld [vmem:[#allocation4] sm:$0xf] }
  0xf4   : > { %v876_v31 = vpack.c.b16 %v875_v29, %v875_v29  ;;  %v947_v35 = vunpack.c.l.b16 %v943_v34 }
  0xf5   : > { %v804_v33 = vpack.c.b16 %v803_v30, %v803_v30 }
  0xf6   : > { %877 = vrot.lane.b32.xlu2 %v876_v31, %s2004_s23  ;;  %954 = vrot.lane.b32.xlu1 %v953_v32, %s2006_s5  ;;  %v948_v36 = vpack.c.b16 %v947_v35, %v947_v35 }
  0xf7   : > { %805 = vrot.lane.b32.xlu0 %v804_v33, %s2005_s25 }
  0xfe   : > { %949 = vrot.lane.b32.xlu2 %v948_v36, %s2006_s5 }
 0x150   : > { %v878_v43 = vpop.permute.xlu2 %877 }
 0x158   : > { %v950_v54 = vpop.permute.xlu2 %949 }
 0x160   : > { %v883_v38 = vpop.permute.xlu1 %882 }
 0x161   : > { %v811_v39 = vpop.permute.xlu0 %810  ;;  %v888_v41 = vsel %vm740_vm2, %v883_v38, 0 }
 0x162   : > { %v816_v40 = vsel %vm740_vm2, %v811_v39, 0  ;;  %897 = vmatpush.bf16.xpose.msrb.mxu3 %v888_v41  ;;  %v945_v39 = vld [vmem:[#allocation3] sm:$0xf] }
 0x163   : > { %825 = vmatpush.bf16.xpose.msrb.mxu1 %v816_v40  ;;  %v991_v40 = vunpack.c.l.b16 %v945_v39 }
 0x165   : > { %v992_v41 = vpack.c.b16 %v991_v40, %v991_v40 }
 0x168   : > { %v955_v44 = vpop.permute.xlu1 %954 }
 0x169   : > { %v960_v45 = vsel %vm740_vm2, %v955_v44, 0  ;;  %v806_v46 = vpop.permute.xlu0 %805  ;;  %1434 = vmatmul.msk.bf16.vlgmr.msrb.gmra.mxu3 %vm740_vm2, %v878_v43  ;;  %v919_v43 = vunpack.c.l.b16 %v873_v42 }
 0x16a   : > { %1431 = vmatmul.msk.bf16.vlgmr.msrb.gmra.mxu1 %vm740_vm2, %v806_v46  ;;  %1067 = vmatpush.bf16.msra.mxu3 %v1463_v15 }
 0x16b   : > { %969 = vmatpush.bf16.xpose.msra.mxu1 %v960_v45  ;;  %v920_v44 = vpack.c.b16 %v919_v43, %v919_v43 }
 0x16e   : > { %1068 = vmatpush.bf16.msra.mxu3 %v1462_v16 }
 0x174   : > { %v756_v51 = vpop.f32.mrf.mxu3 }
 0x175   : > { %v763_v52 = vsel %vm2299_vm4, -1e+09, %v756_v51 }
 0x176   : > { %v764_v53 = vsel %vm740_vm2, %v763_v52, -inf }
 0x177   : > { %765 = vmax.xlane.f32.xlu1 %v764_v53 }
 0x17a   : > { %1437 = vmatmul.msk.bf16.vlgmr.msra.gmra.mxu1 %vm740_vm2, %v950_v54 }
 0x17c   : > { %v758_v55 = vpop.f32.mrf.mxu3 }
 0x1e7   : > { %v827_v61 = vpop.f32.mrf.mxu1 }
 0x1e8   : > { %v831_v62 = vsel %vm2299_vm4, -1e+09, %v827_v61 }
 0x1e9   : > { %v832_v63 = vsel %vm740_vm2, %v831_v62, -inf }
 0x1ea   : > { %833 = vmax.xlane.f32.xlu0 %v832_v63  ;;  %v766_v0 = vpop.xlane.xlu1 %765 }
 0x1eb   : > { %v767_v1 = vsub.f32 %v763_v52, %v766_v0 }
 0x1ec   : > { %v899_v2 = vpop.f32.mrf.mxu3 }
 0x1ed   : > { %v768_v3 = vmul.f32 1.442695, %v767_v1  ;;  %v903_v12 = vsel %vm2299_vm4, -1e+09, %v899_v2 }
 0x1ee   : > { %v904_v14 = vsel %vm740_vm2, %v903_v12, -inf }
 0x1ef   : > { %v829_v5 = vpop.f32.mrf.mxu1  ;;  %1602 = vpow2.f32 %v768_v3 }
 0x1f4   : > { %v901_v6 = vpop.f32.mrf.mxu3 }
 0x1f5   : > { %v1603_v7 = vpop.eup %1602 }
 0x1f6   : > { %v770_v9 = vsel %vm740_vm2, %v1603_v7, 0.0 }
 0x1f7   : > { %v971_v8 = vpop.f32.mrf.mxu1  ;;  %771 = vadd.xlane.f32.xlu1 %v770_v9 }
 0x1f8   : > { %v975_v10 = vsel %vm2299_vm4, -1e+09, %v971_v8 }
 0x1f9   : > { %v976_v11 = vsel %vm740_vm2, %v975_v10, -inf }
 0x1fa   : > { %977 = vmax.xlane.f32.xlu2 %v976_v11 }
 0x1ff   : > { %v973_v13 = vpop.f32.mrf.mxu1 }
 0x202   : > { %905 = vmax.xlane.f32.xlu2 %v904_v14 }
 0x21a   : > { %849 = vrot.lane.b32.xlu2 %v848_v17, %s2005_s25  ;;  %s1882_s25 = scalar_lea.hbm %s2470_s30, 32 }
 0x21b   : > { %p1884_p10 = scmp.lt.s32.totalorder %s1882_s25, %s1878_s12 }
 0x21d   : > { %p1885_p11 = por %p1884_p10, %p1883_p8 }
 0x21f   : > { %p1886_p12 = pnand %p1885_p11, %p1881_p4 }
 0x25d   : > { %v834_v18 = vpop.xlane.xlu0 %833 }
 0x25e   : > { %v835_v19 = vsub.f32 %v831_v62, %v834_v18 }
 0x260   : > { %v836_v20 = vmul.f32 1.442695, %v835_v19 }
 0x262   : > { %1604 = vpow2.f32 %v836_v20 }
 0x268   : > { %v1605_v21 = vpop.eup %1604 }
 0x269   : > { %v838_v22 = vsel %vm740_vm2, %v1605_v21, 0.0 }
 0x26a   : > { %839 = vadd.xlane.f32.xlu0 %v838_v22  ;;  %v772_v23 = vpop.xlane.xlu1 %771 }
 0x26b   : > { %1606 = vrcp.f32 %v772_v23 }
 0x26d   : > { %v978_v24 = vpop.xlane.xlu2 %977 }
 0x26e   : > { %v979_v25 = vsub.f32 %v975_v10, %v978_v24 }
 0x270   : > { %v980_v26 = vmul.f32 1.442695, %v979_v25 }
 0x271   : > { %v1607_v27 = vpop.eup %1606 }
 0x272   : > { %1608 = vpow2.f32 %v980_v26  ;;  %v774_v28 = vmul.f32 %v1607_v27, %v1603_v7 }
 0x274   : > { %v775_v30 = vpack.c.bf16 %v774_v28, %v774_v28 }
 0x275   : > { %v906_v29 = vpop.xlane.xlu2 %905 }
 0x276   : > { %v907_v31 = vsub.f32 %v903_v12, %v906_v29  ;;  %777 = vst.msk [vmem:[%s2322_s8] sm:$0xf] %vm776_vm6, %v775_v30  ;;  %1430 = vmatmul.msk.bf16.vlgmr.msrb.gmra.mxu0 %vm740_vm2, %v775_v30  ;;  %v2011_v29 = vmov 32.0  }
 0x278   : > { %v1609_v32 = vpop.eup %1608  ;;  %v908_v33 = vmul.f32 1.442695, %v907_v31 }
 0x279   : > { %v982_v34 = vsel %vm740_vm2, %v1609_v32, 0.0 }
 0x27a   : > { %1610 = vpow2.f32 %v908_v33  ;;  %983 = vadd.xlane.f32.xlu0 %v982_v34 }
 0x27d   : > { %v850_v35 = vpop.permute.xlu2 %849 }
 0x27e   : > { %v855_v36 = vsel %vm781_vm5, %v850_v35, 0 }
 0x27f   : > { %864 = vmatpush.bf16.msrb.mxu2 %v855_v36 }
 0x280   : > { %v1611_v37 = vpop.eup %1610 }
 0x281   : > { %v910_v38 = vsel %vm740_vm2, %v1611_v37, 0.0 }
 0x282   : > { %911 = vadd.xlane.f32.xlu1 %v910_v38 }
 0x28e   : > { %993 = vrot.lane.b32.xlu0 %v992_v41, %s2006_s5 }
 0x29b   : > { %921 = vrot.lane.b32.xlu1 %v920_v44, %s2004_s23 }
 0x2dd   : > { %v840_v45 = vpop.xlane.xlu0 %839 }
 0x2de   : > { %1612 = vrcp.f32 %v840_v45 }
 0x2e4   : > { %v1613_v46 = vpop.eup %1612 }
 0x2e5   : > { %v842_v47 = vmul.f32 %v1613_v46, %v1605_v21 }
 0x2e7   : > { %v843_v48 = vpack.c.bf16 %v842_v47, %v842_v47 }
 0x2e9   : > { %1432 = vst.msk [vmem:[%s2322_s8 + $0x4] sm:$0xf] %vm776_vm6, %v843_v48  ;;  %1433 = vmatmul.msk.bf16.vlgmr.msrb.gmra.mxu2 %vm740_vm2, %v843_v48 }
 0x2ed   : > { %v984_v49 = vpop.xlane.xlu0 %983 }
 0x2ee   : > { %1614 = vrcp.f32 %v984_v49 }
 0x2f3   : > { %v794_v51 = vpop.f32.mrf.mxu0 }
 0x2f4   : > { %v1615_v50 = vpop.eup %1614  ;;  %v798_v18 = vpack.c.bf16 %v794_v51, %v794_v51 }
 0x2f5   : > { %v986_v52 = vmul.f32 %v1615_v50, %v1609_v32  ;;  %v912_v53 = vpop.xlane.xlu1 %911 }
 0x2f6   : > { %1616 = vrcp.f32 %v912_v53 }
 0x2f7   : > { %v987_v54 = vpack.c.bf16 %v986_v52, %v986_v52  ;;  %1618 = vrcp.f32 %v2011_v29 }
 0x2f9   : > { %1438 = vst.msk [vmem:[%s2322_s8 + $0xc] sm:$0xf] %vm776_vm6, %v987_v54 }
 0x2fb   : > { %v796_v56 = vpop.f32.mrf.mxu0 }
 0x2fc   : > { %v1617_v55 = vpop.eup %1616 }
 0x2fd   : > { %v914_v57 = vmul.f32 %v1617_v55, %v1611_v37  ;;  %v1619_v30 = vpop.eup %1618 }
 0x2fe   : > { %v1079_v31 = vmul.f32 32.0, %v1619_v30  ;;  %vm1083_vm9 = vweird.f32 %v1619_v30 }
 0x2ff   : > { %v915_v58 = vpack.c.bf16 %v914_v57, %v914_v57 }
 0x300   : > { %v994_v59 = vpop.permute.xlu0 %993  ;;  %v1080_v32 = vsub.f32 1.0, %v1079_v31 }
 0x301   : > { %1435 = vst.msk [vmem:[%s2322_s8 + $0x8] sm:$0xf] %vm776_vm6, %v915_v58  ;;  %v999_v60 = vsel %vm781_vm5, %v994_v59, 0 }
 0x302   : > { %1008 = vmatpush.bf16.msra.mxu2 %v999_v60  ;;  %v1081_v33 = vmul.f32 %v1619_v30, %v1080_v32 }
 0x304   : > { %v1082_v34 = vadd.f32 %v1619_v30, %v1081_v33 }
 0x305   : > { %1439 = vmatmul.msk.bf16.vlgmr.msra.gmra.mxu2 %vm740_vm2, %v987_v54 }
 0x306   : > { %v1084_v35 = vsel %vm1083_vm9, %v1619_v30, %v1082_v34 }
 0x30d   : > { %v922_v61 = vpop.permute.xlu1 %921 }
 0x30e   : > { %v927_v62 = vsel %vm781_vm5, %v922_v61, 0 }
 0x30f   : > { %936 = vmatpush.bf16.msra.mxu0 %v927_v62 }
 0x312   : > { %1436 = vmatmul.msk.bf16.vlgmr.msra.gmra.mxu0 %vm740_vm2, %v915_v58 }
 0x36c   : > { %v866_v63 = vpop.f32.mrf.mxu2 }
 0x36d   : > { %v870_v0 = vpack.c.bf16 %v866_v63, %v866_v63 }
 0x36f   : > { %v1016_v1 = vunpack.c.l.b16 %v870_v0 }
 0x371   : > { %v1017_v2 = vpack.c.b16 %v1016_v1, %v1016_v1 }
 0x373   : > { %1018 = vrot.lane.b32.xlu2 %v1017_v2, %s2008_s10 }
 0x374   : > { %v868_v3 = vpop.f32.mrf.mxu2 }
 0x388   : > { %v1010_v5 = vpop.f32.mrf.mxu2 }
 0x389   : > { %v1014_v6 = vpack.c.bf16 %v1010_v5, %v1010_v5 }
 0x38b   : > { %v1026_v7 = vunpack.c.l.b16 %v1014_v6 }
 0x38d   : > { %v1027_v8 = vpack.c.b16 %v1026_v7, %v1026_v7 }
 0x38f   : > { %1028 = vrot.lane.b32.xlu2 %v1027_v8, %s2009_s11  ;;  %v938_v9 = vpop.f32.mrf.mxu0 }
 0x390   : > { %v942_v10 = vpack.c.bf16 %v938_v9, %v938_v9  ;;  %v1012_v11 = vpop.f32.mrf.mxu2 }
 0x392   : > { %v1021_v12 = vunpack.c.l.b16 %v942_v10 }
 0x394   : > { %v1022_v13 = vpack.c.b16 %v1021_v12, %v1021_v12 }
 0x396   : > { %1023 = vrot.lane.b32.xlu0 %v1022_v13, %s2010_s17 }
 0x397   : > { %v940_v14 = vpop.f32.mrf.mxu0 }
 0x3cd   : > { %v1019_v17 = vpop.permute.xlu2 %1018 }
 0x3ce   : > { %v1032_v19 = vsel %vm740_vm2, %v798_v18, %v1019_v17 }
 0x3e9   : > { %v1029_v21 = vpop.permute.xlu2 %1028 }
 0x408   : > { %v1024_v20 = vpop.permute.xlu0 %1023 }
 0x409   : > { %v1035_v22 = vsel %vm1033_vm7, %v1032_v19, %v1024_v20 }
 0x40a   : > { %v1038_v23 = vsel %vm1036_vm8, %v1035_v22, %v1029_v21 }
 0x40b   : > { %1040 = vst.msk [vmem:[#allocation5] sm:$0xf] %vm659_vm1, %v1038_v23 }
 0x412   : > { %v1041_v24 = vld [vmem:[#allocation5] sm:$0xf] }
 0x413   : > { %1448 = vmatmul.msk.bf16.vlgmr.msra.gmra.mxu3 %vm641_vm0, %v1041_v24 }
 0x496   : > { %v1070_v25 = vpop.f32.mrf.mxu3 }
 0x497   : > { %v1074_v26 = vadd.f32 %v1070_v25, %v2275_v4 }
 0x499   : > { %v1075_v27 = vsel %vm641_vm0, %v1074_v26, 0.0 }
 0x49a   : > { %1076 = vadd.xlane.f32.xlu1 %v1075_v27 }
 0x49e   : > { %v1072_v28 = vpop.f32.mrf.mxu3 }
 0x50d   : > { %v1077_v36 = vpop.xlane.xlu1 %1076 }
 0x50e   : > { %v1085_v37 = vmul.f32 %v1084_v35, %v1077_v36 }
 0x510   : > { %v1086_v4 = vsub.f32 %v1074_v26, %v1085_v37 }
 0x512   : > { %v1087_v38 = vmul.f32 %v1086_v4, %v1086_v4 }
 0x514   : > { %v1088_v39 = vsel %vm641_vm0, %v1087_v38, 0.0 }
 0x515   : > { %1089 = vadd.xlane.f32.xlu0 %v1088_v39 }
 0x516   : > { %1889 = shalt.err (!%p1886_p12)
}
 0x517   : > { %s2012_s8 = smov 64   ;;  %s2013_s10 = smov 4  }
 0x518   : > { %1490 = dma.vmem_to_hbm [thread:$0]  (%p2163_p7), %s1150_s9, 256, %s1152_s14, %s1121_s20, %s2012_s8, %s2012_s8, %s2013_s10  }
 0x519   : > { %s1451_s11 = sshll.u32 %s2468_s19, 3  ;;  %s2471_s16 = sld [smem:[#allocation41_spill]] }
 0x51a   : > { %s2472_s9 = sld [smem:[#allocation43_spill]]  ;;  %s609_s19 = scalar_lea.vmem [#allocation20], %s1392_s13 }
 0x51b   : > { %s2473_s12 = sld [smem:[#allocation42_spill]]  ;;  %s1134_s15 = sshll.u32 %s609_s19, 4  ;;  %s1135_s15 = int_to_ptr.vmem [resolvable:$true] %s1134_s15 }
 0x51c   : > { %s1116_s25 = scalar_lea.sflag [#allocation8], %s2238_s4 }
 0x51f   : > { %v1600_v49 = vld [vmem:[%s2471_s16] ss:$0 sm:$0xff] }
 0x520   : > { %s1132_s14 = scalar_lea.hbm %s2472_s9, %s1451_s11  ;;  %s1910_s13 = scalar_lea.hbm %s2472_s9, 16 }
 0x521   : > { %v1601_v52 = vld [vmem:[%s2473_s12] ss:$0 sm:$0xff]  ;;  %s1136_s23 = sshll.u32 %s1132_s14, 4  ;;  %s1137_s23 = int_to_ptr.hbm [resolvable:$true] %s1136_s23 }
 0x522   : > { %s1904_s5 = sshra.s32 %s1137_s23, 4  ;;  %s1905_s5 = int_to_ptr.hbm [resolvable:$true] %s1904_s5 }
 0x523   : > { %s1906_s1 = scalar_lea.hbm %s1905_s5, 8  ;;  %p1911_p5 = scmp.lt.s32.totalorder %s1905_s5, %s2472_s9 }
 0x524   : > { %p1907_p13 = scmp.ne.s32.totalorder %s1905_s5, %s1906_s1  ;;  %p1912_p9 = scmp.lt.s32.totalorder %s1910_s13, %s1906_s1 }
 0x526   : > { %p1908_p0 = pnand %p1907_p13, %p2163_p7  ;;  %p1913_p1 = por %p1912_p9, %p1911_p5 }
 0x528   : > { %p1909_p3 = pneg %p1908_p0 }
 0x52a   : > { %p1914_p2 = pnand %p1913_p1, %p1909_p3 }
 0x588   : > { %v1090_v40 = vpop.xlane.xlu0 %1089 }
 0x589   : > { %v1091_v41 = vmul.f32 %v1090_v40, %v1084_v35 }
 0x58b   : > { %v1092_v42 = vadd.f32 1e-05, %v1091_v41 }
 0x58d   : > { %1620 = vrsqrt.f32 %v1092_v42  ;;  %vm1099_vm11 = vweird.f32 %v1092_v42 }
 0x593   : > { %v1621_v43 = vpop.eup %1620 }
 0x594   : > { %v1094_v44 = vmul.f32 %v1621_v43, %v1092_v42  ;;  %vm1100_vm10 = vweird.f32 %v1621_v43 }
 0x595   : > { %vm1101_vm12 = vmor %vm1099_vm11, %vm1100_vm10 }
 0x596   : > { %v1095_v45 = vmul.f32 %v1621_v43, %v1094_v44 }
 0x598   : > { %v1096_v46 = vmul.f32 0.5, %v1095_v45 }
 0x59a   : > { %v1097_v47 = vsub.f32 1.5, %v1096_v46 }
 0x59c   : > { %v1098_v48 = vmul.f32 %v1621_v43, %v1097_v47 }
 0x59e   : > { %v1102_v50 = vsel %vm1101_vm12, %v1621_v43, %v1098_v48 }
 0x59f   : > { %v1103_v51 = vmul.f32 %v1102_v50, %v1086_v4 }
 0x5a1   : > { %v1108_v53 = vmul.f32 %v1600_v49, %v1103_v51 }
 0x5a3   : > { %v1113_v54 = vadd.f32 %v1601_v52, %v1108_v53 }
 0x5a5   : > { %1114 = vst.msk [vmem:[%s609_s19] sm:$0xff] %vm641_vm0, %v1113_v54 }
 0x5a6   : > { %1917 = shalt.err (!%p1914_p2)
}
 0x5a7   : > { %1489 = dma.vmem_to_hbm [thread:$0]  (%p2163_p7), %s1135_s15, 128, %s1137_s23, %s1116_s25  }
 0x5a8 PF: > { %s2474_s4 = sld [smem:[#allocation31_spill]]  ;;  %p2476_p4 = scmp.ge.s32.totalorder %s1996_s22, 2 }
 0x5aa   : > { %p1520_p8 = pnand %p2476_p4, %p2119_p6 }
 0x5ac   : > { %p1521_p10 = pneg %p1520_p8 }
 0x5ae   : > { %s1166_s16 = sand.u32 1, %s2474_s4  }
 0x5af   : > { %s1167_s26 = scalar_lea.sflag [#allocation8], %s1166_s16 }
 0x5b0   : > { %1967 = dma.done.wait (%p1521_p10), %s1167_s26, 128  }
 0x5b1   : > { %1969 = vsyncadd (%p1521_p10), %s1167_s26, 4294967168  ;;  %s1177_s24 = scalar_lea.sflag [#allocation22], %s1166_s16 }
 0x5b2   : > { %1971 = dma.done.wait (%p1521_p10), %s1177_s24, 256  }
 0x5b3   : > { %1973 = vsyncadd (%p1521_p10), %s1177_s24, 4294967040  ;;  %s39_s22 = sadd.s32 1, %s1996_s22   ;;  %s2477_s27 = sld [smem:[#allocation32_spill]] }
 0x5b4   : > { %p36_p11 = scmp.ge.s32.totalorder %s39_s22, 4   ;;  %s2478_s19 = sld [smem:[#allocation37_spill]] }
 0x5b5   : > { %s2479_s14 = sld [smem:[#allocation35_spill]]  ;;  %s2480_s17 = smov %s1980_s18 }
 0x5b6   : > { %s2482_s20 = smov %s1992_s21 }
 0x5b7   :  { %38 = sbr.rel (!%p36_p11) target bundleno = 22 (0x16), region = 182 }
 0x5b9   : > { %s2481_s18 = smov %s2477_s27 }
 0x5bb   : > { %s2483_s21 = smov %s2479_s14 }
 0x5bc   :  { %1183 = vsyncpa [#allocation7], 1 }
 0x5bd   :  { %1185 = vsyncpa [#allocation7 + $0x1], 1 }
 0x5be   :  { %1186 = vsyncpa [#allocation10], 1 }
 0x5bf   :  { %1188 = vsyncpa [#allocation10 + $0x1], 1 }
 0x5c0   :  { %1189 = vsyncpa [#allocation13], 1 }
 0x5c1   :  { %1191 = vsyncpa [#allocation13 + $0x1], 1 }
 0x5c2   :  { %1192 = vsyncpa [#allocation16], 1 }
 0x5c3   :  { %1193 = vsyncpa [#allocation19], 1 }
 0x5c4   :  { %1194 = vsyncpa [#allocation8], 1 }
 0x5c5   :  { %1196 = vsyncpa [#allocation8 + $0x1], 1 }
 0x5c6   :  { %1197 = vsyncpa [#allocation22], 1 }
 0x5c7   :  { %1199 = vsyncpa [#allocation22 + $0x1], 1 }

</bundles_post_ra>
